<compile_context>
chip_gen: v6e
topology: v6e:2x2x1
jax: 0.10.0
libtpu: 0.0.40
codegen_flags: <defaults>
</compile_context>

<pallas_src>
import math
from functools import partial

import numpy as np
import jax
import jax.numpy as jnp
from jax.experimental import pallas as pl
from jax.experimental.pallas import tpu as pltpu


def net_pattern(n_layers, base_size, ratio, maxv=1024):
    return [int(min(max(math.ceil(base_size * ratio ** i), 0), maxv))
            for i in range(n_layers)]


def _round_up(v, m):
    return (v + m - 1) // m * m


def pack_params(params):
    """Pack the 5 (W, b) pairs into one weight slab and one bias slab.

    Weight matrices are stacked along rows at sublane-aligned (multiple-of-8)
    offsets; each bias occupies one row of an (8, C) slab.  This keeps the
    kernel at 4 input DMA descriptors instead of 13.
    """
    (wl, bl), (wc1, bc1), (wc2, bc2), (we, be), (wp, bp) = params
    weights = [wl, wc1, wc2, we, np.asarray(wp).reshape(1, -1)]  # wp as a row
    biases = [bl, bc1, bc2, be]
    assert len(biases) + 1 <= 8, "bias slab supports at most 8 rows"
    ncols = max(int(w.shape[1]) for w in weights)

    offsets, rows = [], 0
    for w in weights:
        offsets.append(rows)
        rows = _round_up(rows + int(w.shape[0]), 8)
    w_packed = np.zeros((rows, ncols), np.float32)
    for off, w in zip(offsets, weights):
        w_packed[off:off + w.shape[0], :w.shape[1]] = np.asarray(w)

    b_packed = np.zeros((8, ncols), np.float32)
    for i, b in enumerate(biases):
        b_packed[i, :b.shape[1]] = np.asarray(b).reshape(-1)
    b_packed[len(biases), 0] = float(np.asarray(bp).reshape(-1)[0])
    return jnp.asarray(w_packed), jnp.asarray(b_packed), tuple(offsets)


# ----------------------------- Pallas kernel --------------------------------
def _gcn_kernel(x_ref, a_ref, w_ref, b_ref, out_ref, *, dims, w_offs,
                nodes_per_graph, graphs_per_tile):
    f32 = jnp.float32
    node_dim, c0, c1, c2, emb = dims
    o_l, o_c1, o_c2, o_e, o_p = w_offs

    # static slices out of the packed parameter slabs
    wl = w_ref[o_l:o_l + node_dim, :c0]
    wc1 = w_ref[o_c1:o_c1 + c0, :c1]
    wc2 = w_ref[o_c2:o_c2 + c1, :c2]
    we = w_ref[o_e:o_e + c2, :emb]
    wp_row = w_ref[o_p:o_p + 1, :emb]          # (1, emb)  == pred.weight
    bl = b_ref[0:1, :c0]
    bc1 = b_ref[1:2, :c1]
    bc2 = b_ref[2:3, :c2]
    be = b_ref[3:4, :emb]
    bp = b_ref[4:5, 0:1]                       # (1, 1)    == pred.bias

    # dense per-tile normalized adjacency (block-diag structure stored dense)
    a = a_ref[0]                               # (tile_nodes, tile_nodes)

    # linatoms: (tN, node_dim) @ (node_dim, c0) + b
    h = jnp.dot(x_ref[...], wl, preferred_element_type=f32) + bl       # (tN,c0)

    # GCNConv 1: A_hat @ (H W) + b, relu  -- single dense MXU dot, no reshapes
    hw = jnp.dot(h, wc1, preferred_element_type=f32)
    h = jnp.maximum(jnp.dot(a, hw, preferred_element_type=f32) + bc1, 0.0)

    # GCNConv 2
    hw = jnp.dot(h, wc2, preferred_element_type=f32)
    h = jnp.maximum(jnp.dot(a, hw, preferred_element_type=f32) + bc2, 0.0)

    # graph_emb: Linear + relu (per node)
    h = jnp.maximum(jnp.dot(h, we, preferred_element_type=f32) + be, 0.0)

    # global_add_pool: graphs are contiguous, equal-size segments -> reshape+sum
    # TODO(synk): if graphs become ragged, switch to a segment-sum driven by
    # scalar-prefetched offsets instead of this reshape.
    g = h.reshape(graphs_per_tile, nodes_per_graph, emb).sum(axis=1)   # (Gt,emb)

    # pred head: out[0, g] = wp . g_row + bp  (graphs along lanes)
    out = jnp.einsum('oe,ge->og', wp_row, g, preferred_element_type=f32) + bp
    out_ref[...] = out.reshape(1, 1, graphs_per_tile)


def gcn_forward(x, a_tiles, w_packed, b_packed, dims, w_offs,
                nodes_per_graph, graphs_per_tile):
    """GCN forward; 1-D grid over graph tiles (parallel across TCs on v7x)."""
    num_tiles, tile_nodes, _ = a_tiles.shape
    N, node_dim = x.shape
    assert tile_nodes == graphs_per_tile * nodes_per_graph
    assert N == num_tiles * tile_nodes
    c0, c1, c2, emb = dims[1], dims[2], dims[3], dims[4]
    G = num_tiles * graphs_per_tile

    flops = (2 * N * (node_dim * c0 + c0 * c1 + c1 * c2 + c2 * emb + emb)
             + 2 * num_tiles * tile_nodes * tile_nodes * (c1 + c2))
    bytes_accessed = 4 * (int(x.size) + int(a_tiles.size)
                          + int(w_packed.size) + int(b_packed.size) + G)

    kernel = partial(_gcn_kernel, dims=dims, w_offs=w_offs,
                     nodes_per_graph=nodes_per_graph,
                     graphs_per_tile=graphs_per_tile)
    out = pl.pallas_call(
        kernel,
        out_shape=jax.ShapeDtypeStruct((num_tiles, 1, graphs_per_tile),
                                       jnp.float32),
        grid=(num_tiles,),
        in_specs=[
            pl.BlockSpec((tile_nodes, node_dim), lambda i: (i, 0)),       # x
            pl.BlockSpec((1, tile_nodes, tile_nodes), lambda i: (i, 0, 0)),  # A
            pl.BlockSpec(w_packed.shape, lambda i: (0, 0)),               # W slab
            pl.BlockSpec(b_packed.shape, lambda i: (0, 0)),               # b slab
        ],
        out_specs=pl.BlockSpec((1, 1, graphs_per_tile), lambda i: (i, 0, 0)),
        cost_estimate=pl.CostEstimate(flops=flops, transcendentals=0,
                                      bytes_accessed=bytes_accessed),
        compiler_params=pltpu.CompilerParams(
            dimension_semantics=("parallel",),
            vmem_limit_bytes=4 * 1024 * 1024),
    )(x, a_tiles, w_packed, b_packed)
    return out.reshape(-1)   # .view(-1)


# ----------------------------- pure-JAX reference ----------------------------
def gcn_reference(x, a_graphs, params, num_graphs, nodes_per_graph):
    (wl, bl), (wc1, bc1), (wc2, bc2), (we, be), (wp, bp) = params
    N = x.shape[0]
    n = nodes_per_graph
    a_dense = np.zeros((N, N), np.float32)
    for gi in range(num_graphs):
        a_dense[gi * n:(gi + 1) * n, gi * n:(gi + 1) * n] = np.asarray(a_graphs[gi])
    a_dense = jnp.asarray(a_dense)
    batch = np.repeat(np.arange(num_graphs), n)
    pool = jnp.asarray(
        (batch[None, :] == np.arange(num_graphs)[:, None]).astype(np.float32))

    h = x @ wl + bl
    h = jnp.maximum(a_dense @ (h @ wc1) + bc1, 0.0)
    h = jnp.maximum(a_dense @ (h @ wc2) + bc2, 0.0)
    h = jnp.maximum(h @ we + be, 0.0)
    g = pool @ h
    return (g @ wp + bp).reshape(-1)


# ----------------------------- glue / setup ----------------------------------
def linear_init(kw, kb, fan_in, fan_out):
    bound = 1.0 / math.sqrt(fan_in)
    w = jax.random.uniform(kw, (fan_in, fan_out), jnp.float32, -bound, bound)
    b = jax.random.uniform(kb, (1, fan_out), jnp.float32, -bound, bound)
    return w, b


if __name__ == "__main__":
    hparams = dict(conv_base_size=32, conv_n_layers=2, conv_ratio=1.0,
                   emb_dim=32, conv_act='relu', conv_batchnorm=False,
                   emb_set2set=False, emb_act='relu', mlp_layers=0)
    node_dim = 16
    nodes_per_graph = 16
    graphs_per_tile = 16
    num_tiles = 4
    num_graphs = num_tiles * graphs_per_tile          # 64 graphs
    N = num_graphs * nodes_per_graph                  # 1024 nodes total
    tile_nodes = graphs_per_tile * nodes_per_graph    # 256 nodes per tile

    conv_dims = net_pattern(hparams['conv_n_layers'], hparams['conv_base_size'],
                            hparams['conv_ratio']) + [hparams['emb_dim']]
    c0 = hparams['conv_base_size']
    c1, c2 = conv_dims[1], conv_dims[2]
    emb = hparams['emb_dim']

    key = jax.random.PRNGKey(0)
    keys = jax.random.split(key, 11)
    x = jax.random.normal(keys[0], (N, node_dim), jnp.float32)

    # deterministic per-graph structure: ring + one graph-dependent chord,
    # plus self loops; symmetric normalization A_hat = D^-1/2 (A+I) D^-1/2.
    a_graphs = []
    for gi in range(num_graphs):
        a = np.zeros((nodes_per_graph, nodes_per_graph), np.float32)
        for i in range(nodes_per_graph):
            j = (i + 1) % nodes_per_graph
            a[i, j] = 1.0
            a[j, i] = 1.0
        chord = 2 + gi % (nodes_per_graph - 4)
        a[0, chord] = 1.0
        a[chord, 0] = 1.0
        a += np.eye(nodes_per_graph, dtype=np.float32)
        dinv = 1.0 / np.sqrt(a.sum(axis=1))
        a_graphs.append(dinv[:, None] * a * dinv[None, :])

    # dense per-tile A_hat (graphs within a tile are independent -> block-diag
    # structure, but stored dense so each conv layer is one MXU dot per tile)
    a_tiles = np.zeros((num_tiles, tile_nodes, tile_nodes), np.float32)
    for t in range(num_tiles):
        for gl in range(graphs_per_tile):
            gi = t * graphs_per_tile + gl
            s = gl * nodes_per_graph
            a_tiles[t, s:s + nodes_per_graph, s:s + nodes_per_graph] = a_graphs[gi]
    a_tiles = jnp.asarray(a_tiles)

    # deterministic parameters (shapes from GCN.__init__)
    params = (linear_init(keys[1], keys[2], node_dim, c0),       # linatoms
              linear_init(keys[3], keys[4], conv_dims[0], c1),   # GCNConv 1
              linear_init(keys[5], keys[6], c1, c2),             # GCNConv 2
              linear_init(keys[7], keys[8], emb, emb),           # graph_emb
              linear_init(keys[9], keys[10], emb, 1))            # pred

    w_packed, b_packed, w_offs = pack_params(params)
    dims = (node_dim, c0, c1, c2, emb)

    out = jax.block_until_ready(
        gcn_forward(x, a_tiles, w_packed, b_packed, dims, w_offs,
                    nodes_per_graph, graphs_per_tile))
    ref = jax.block_until_ready(
        gcn_reference(x, a_graphs, params, num_graphs, nodes_per_graph))

    assert out.shape == (num_graphs,)
    assert np.allclose(np.asarray(out), np.asarray(ref), atol=2e-3, rtol=2e-3)
    print("KERNEL_OK")
</pallas_src>

<mosaic_0001>
module attributes {stable_mosaic.version = 11 : i64} {
  func.func @_gcn_kernel(%arg0: i32, %arg1: memref<256x16xf32, #tpu.memory_space<vmem>>, %arg2: memref<1x256x256xf32, #tpu.memory_space<vmem>>, %arg3: memref<120x32xf32, #tpu.memory_space<vmem>>, %arg4: memref<8x32xf32, #tpu.memory_space<vmem>>, %arg5: memref<1x1x16xf32, #tpu.memory_space<vmem>>) attributes {dimension_semantics = [#tpu.dimension_semantics<parallel>], iteration_bounds = array<i64: 4>, scalar_prefetch = 0 : i64, scratch_operands = 0 : i64, tpu.core_type = #tpu.core_type<tc>, window_params = [{transform_indices = @transform_0, window_bounds = array<i64: 256, 16>}, {transform_indices = @transform_1, window_bounds = array<i64: 1, 256, 256>}, {pipeline_mode = #tpu.pipeline_mode<synchronous>, transform_indices = @transform_2, window_bounds = array<i64: 120, 32>}, {pipeline_mode = #tpu.pipeline_mode<synchronous>, transform_indices = @transform_3, window_bounds = array<i64: 8, 32>}, {transform_indices = @transform_4, window_bounds = array<i64: 1, 1, 16>}]} {
    %c0 = arith.constant 0 : index
    %c0_0 = arith.constant 0 : index
    %0 = vector.load %arg3[%c0, %c0_0] : memref<120x32xf32, #tpu.memory_space<vmem>>, vector<16x32xf32>
    %c16 = arith.constant 16 : index
    %c0_1 = arith.constant 0 : index
    %1 = vector.load %arg3[%c16, %c0_1] : memref<120x32xf32, #tpu.memory_space<vmem>>, vector<32x32xf32>
    %c48 = arith.constant 48 : index
    %c0_2 = arith.constant 0 : index
    %2 = vector.load %arg3[%c48, %c0_2] : memref<120x32xf32, #tpu.memory_space<vmem>>, vector<32x32xf32>
    %c80 = arith.constant 80 : index
    %c0_3 = arith.constant 0 : index
    %3 = vector.load %arg3[%c80, %c0_3] : memref<120x32xf32, #tpu.memory_space<vmem>>, vector<32x32xf32>
    %c112 = arith.constant 112 : index
    %c0_4 = arith.constant 0 : index
    %4 = vector.load %arg3[%c112, %c0_4] : memref<120x32xf32, #tpu.memory_space<vmem>>, vector<1x32xf32>
    %c0_5 = arith.constant 0 : index
    %c0_6 = arith.constant 0 : index
    %5 = vector.load %arg4[%c0_5, %c0_6] : memref<8x32xf32, #tpu.memory_space<vmem>>, vector<1x32xf32>
    %c1 = arith.constant 1 : index
    %c0_7 = arith.constant 0 : index
    %6 = vector.load %arg4[%c1, %c0_7] : memref<8x32xf32, #tpu.memory_space<vmem>>, vector<1x32xf32>
    %c2 = arith.constant 2 : index
    %c0_8 = arith.constant 0 : index
    %7 = vector.load %arg4[%c2, %c0_8] : memref<8x32xf32, #tpu.memory_space<vmem>>, vector<1x32xf32>
    %c3 = arith.constant 3 : index
    %c0_9 = arith.constant 0 : index
    %8 = vector.load %arg4[%c3, %c0_9] : memref<8x32xf32, #tpu.memory_space<vmem>>, vector<1x32xf32>
    %c4 = arith.constant 4 : index
    %c0_10 = arith.constant 0 : index
    %9 = vector.load %arg4[%c4, %c0_10] : memref<8x32xf32, #tpu.memory_space<vmem>>, vector<1x1xf32>
    %c0_11 = arith.constant 0 : index
    %c0_12 = arith.constant 0 : index
    %c0_13 = arith.constant 0 : index
    %10 = vector.load %arg2[%c0_11, %c0_12, %c0_13] : memref<1x256x256xf32, #tpu.memory_space<vmem>>, vector<1x256x256xf32>
    %11 = vector.shape_cast %10 : vector<1x256x256xf32> to vector<256x256xf32>
    %c0_14 = arith.constant 0 : index
    %c0_15 = arith.constant 0 : index
    %12 = vector.load %arg1[%c0_14, %c0_15] : memref<256x16xf32, #tpu.memory_space<vmem>>, vector<256x16xf32>
    %cst = arith.constant dense<0.000000e+00> : vector<256x32xf32>
    %13 = tpu.matmul %12, %0, %cst {dimension_numbers = #tpu.dot_dimension_numbers<[1], [0], [0], [1], [0, 0, 1, 1], [], []>} : vector<256x16xf32>, vector<16x32xf32>, vector<256x32xf32> -> vector<256x32xf32>
    %14 = vector.broadcast %5 : vector<1x32xf32> to vector<256x32xf32>
    %15 = arith.addf %13, %14 : vector<256x32xf32>
    %cst_16 = arith.constant dense<0.000000e+00> : vector<256x32xf32>
    %16 = tpu.matmul %15, %1, %cst_16 {dimension_numbers = #tpu.dot_dimension_numbers<[1], [0], [0], [1], [0, 0, 1, 1], [], []>} : vector<256x32xf32>, vector<32x32xf32>, vector<256x32xf32> -> vector<256x32xf32>
    %cst_17 = arith.constant dense<0.000000e+00> : vector<256x32xf32>
    %17 = tpu.matmul %11, %16, %cst_17 {dimension_numbers = #tpu.dot_dimension_numbers<[1], [0], [0], [1], [0, 0, 1, 1], [], []>} : vector<256x256xf32>, vector<256x32xf32>, vector<256x32xf32> -> vector<256x32xf32>
    %18 = vector.broadcast %6 : vector<1x32xf32> to vector<256x32xf32>
    %19 = arith.addf %17, %18 : vector<256x32xf32>
    %cst_18 = arith.constant 0.000000e+00 : f32
    %20 = vector.broadcast %cst_18 : f32 to vector<256x32xf32>
    %21 = arith.maximumf %19, %20 : vector<256x32xf32>
    %cst_19 = arith.constant dense<0.000000e+00> : vector<256x32xf32>
    %22 = tpu.matmul %21, %2, %cst_19 {dimension_numbers = #tpu.dot_dimension_numbers<[1], [0], [0], [1], [0, 0, 1, 1], [], []>} : vector<256x32xf32>, vector<32x32xf32>, vector<256x32xf32> -> vector<256x32xf32>
    %cst_20 = arith.constant dense<0.000000e+00> : vector<256x32xf32>
    %23 = tpu.matmul %11, %22, %cst_20 {dimension_numbers = #tpu.dot_dimension_numbers<[1], [0], [0], [1], [0, 0, 1, 1], [], []>} : vector<256x256xf32>, vector<256x32xf32>, vector<256x32xf32> -> vector<256x32xf32>
    %24 = vector.broadcast %7 : vector<1x32xf32> to vector<256x32xf32>
    %25 = arith.addf %23, %24 : vector<256x32xf32>
    %cst_21 = arith.constant 0.000000e+00 : f32
    %26 = vector.broadcast %cst_21 : f32 to vector<256x32xf32>
    %27 = arith.maximumf %25, %26 : vector<256x32xf32>
    %cst_22 = arith.constant dense<0.000000e+00> : vector<256x32xf32>
    %28 = tpu.matmul %27, %3, %cst_22 {dimension_numbers = #tpu.dot_dimension_numbers<[1], [0], [0], [1], [0, 0, 1, 1], [], []>} : vector<256x32xf32>, vector<32x32xf32>, vector<256x32xf32> -> vector<256x32xf32>
    %29 = vector.broadcast %8 : vector<1x32xf32> to vector<256x32xf32>
    %30 = arith.addf %28, %29 : vector<256x32xf32>
    %cst_23 = arith.constant 0.000000e+00 : f32
    %31 = vector.broadcast %cst_23 : f32 to vector<256x32xf32>
    %32 = arith.maximumf %30, %31 : vector<256x32xf32>
    %33 = vector.shape_cast %32 : vector<256x32xf32> to vector<16x16x32xf32>
    %cst_24 = arith.constant dense<0.000000e+00> : vector<16x32xf32>
    %34 = vector.multi_reduction <add>, %33, %cst_24 [1] : vector<16x16x32xf32> to vector<16x32xf32>
    "tpu.trace_start"() <{level = 10 : i32, message = "oe,ge->og"}> : () -> ()
    %cst_25 = arith.constant dense<0.000000e+00> : vector<1x16xf32>
    %35 = tpu.matmul %4, %34, %cst_25 {dimension_numbers = #tpu.dot_dimension_numbers<[1], [1], [0], [0], [0, 0, 1, 0], [], []>} : vector<1x32xf32>, vector<16x32xf32>, vector<1x16xf32> -> vector<1x16xf32>
    "tpu.trace_stop"() : () -> ()
    %36 = vector.broadcast %9 : vector<1x1xf32> to vector<1x16xf32>
    %37 = arith.addf %35, %36 : vector<1x16xf32>
    %38 = vector.shape_cast %37 : vector<1x16xf32> to vector<1x1x16xf32>
    %c0_26 = arith.constant 0 : index
    %c0_27 = arith.constant 0 : index
    %c0_28 = arith.constant 0 : index
    %39 = vector.load %arg5[%c0_26, %c0_27, %c0_28] : memref<1x1x16xf32, #tpu.memory_space<vmem>>, vector<1x1x16xf32>
    tpu.vector_store %arg5[%c0_26, %c0_27, %c0_28], %38 {strides = array<i32>} : memref<1x1x16xf32, #tpu.memory_space<vmem>>, vector<1x1x16xf32>,
    return
  }
  func.func @transform_0(%arg0: i32) -> (i32, i32) {
    %c0_i32 = arith.constant 0 : i32
    %c0_i32_0 = arith.constant 0 : i32
    return %arg0, %c0_i32 : i32, i32
  }
  func.func @transform_1(%arg0: i32) -> (i32, i32, i32) {
    %c0_i32 = arith.constant 0 : i32
    %c0_i32_0 = arith.constant 0 : i32
    %c0_i32_1 = arith.constant 0 : i32
    return %arg0, %c0_i32, %c0_i32_0 : i32, i32, i32
  }
  func.func @transform_2(%arg0: i32) -> (i32, i32) {
    %c0_i32 = arith.constant 0 : i32
    %c0_i32_0 = arith.constant 0 : i32
    %c0_i32_1 = arith.constant 0 : i32
    return %c0_i32, %c0_i32_0 : i32, i32
  }
  func.func @transform_3(%arg0: i32) -> (i32, i32) {
    %c0_i32 = arith.constant 0 : i32
    %c0_i32_0 = arith.constant 0 : i32
    %c0_i32_1 = arith.constant 0 : i32
    return %c0_i32, %c0_i32_0 : i32, i32
  }
  func.func @transform_4(%arg0: i32) -> (i32, i32, i32) {
    %c0_i32 = arith.constant 0 : i32
    %c0_i32_0 = arith.constant 0 : i32
    %c0_i32_1 = arith.constant 0 : i32
    return %arg0, %c0_i32, %c0_i32_0 : i32, i32, i32
  }
}

</mosaic_0001>

<bundles_post_ra>
// kernel: tpu_custom_call.1
= control target key start
LH: loop header
LB: loop body
LE: loop exit
PB: predicated region body
PF: predicated region fallthrough
CT: control target
= control target key end

     0   :  { %9 = vsyncpa [#allocation3], 0  ;;  %s4252_s0 = inlined_call_operand.vmem [shape: f32[1024,16], index: 0, kind: input, shape index: {}]   ;;  %s4253_s1 = inlined_call_operand.hbm [shape: f32[4,256,256], index: 1, kind: input, shape index: {}]   ;;  %s4254_s2 = inlined_call_operand.vmem [shape: f32[120,32], index: 2, kind: input, shape index: {}]   ;;  %s4255_s3 = inlined_call_operand.vmem [shape: f32[8,32], index: 3, kind: input, shape index: {}]   ;;  %s4256_s4 = inlined_call_operand.hbm [shape: f32[4,1,16], index: 4, kind: output, shape index: {}]  }
   0x1   :  { %11 = vsyncpa [#allocation3 + $0x1], 0 }
   0x2   :  { %12 = vsyncpa [#allocation4], 0 }
   0x3   :  { %14 = vsyncpa [#allocation4 + $0x1], 0  ;;  %s3256_s15 = smov 0   ;;  %s3258_s16 = smov 0  }
   0x4   :  { %s3260_s17 = smov 0   ;;  %s3262_s18 = smov 0  }
   0x5 LB: > { %s3277_s19 = sadd.s32 4294967295, %s3222_s18   ;;  %s2557_s20 = sadd.s32 4294967294, %s3222_s18   ;;  %s3222_s18 = sphi %s3262_s18, %s4327_s18   ;;  %s3218_s17 = sphi %s3260_s17, %s4326_s17   ;;  %s3214_s16 = sphi %s3258_s16, %s4325_s16   ;;  %s3210_s15 = sphi %s3256_s15, %s4324_s15  }
   0x6   : > { %s3281_s21 = sadd.s32 1, %s3222_s18   ;;  %s53_s22 = sadd.s32 1, %s3218_s17 }
   0x7   : > { %s50_s23 = ssub.s32 %s3222_s18, %s3281_s21  ;;  %p60_p0 = scmp.ne.s32.totalorder %s3218_s17, %s3214_s16 }
   0x8   : > { %p51_p1 = scmp.eq.s32.totalorder %s50_s23, 0  ;;  %p61_p2 = scmp.eq.s32.totalorder %s3222_s18, 0 }
   0x9   : > { %p66_p3 = scmp.ne.s32.totalorder %s3214_s16, %s3210_s15  ;;  %p67_p4 = scmp.eq.s32.totalorder %s3277_s19, 0 }
   0xa   : > { %s3293_s24 = scalar_select %p51_p1, %s3218_s17, %s53_s22  }
   0xb   : > { %p3295_p5 = por %p61_p2, %p60_p0  ;;  %p3299_p6 = por %p67_p4, %p66_p3 }
   0xc   : > { %p132_p7 = scmp.eq.s32.totalorder %s3277_s19, 3  ;;  %p138_p8 = scmp.eq.s32.totalorder %s2557_s20, 3 }
   0xd   : > { %s4280_s26 = scalar_select %p3299_p6, 1, 0 }
   0xe   : > { %p3090_p9 = scmp.lt.s32.totalorder %s3222_s18, 4  ;;  %p3305_p10 = por %p132_p7, %p60_p0 }
   0xf   : > { %p3309_p11 = por %p138_p8, %p66_p3  ;;  %s173_s29 = sand.u32 1, %s3218_s17  }
  0x10   : > { %s4281_s27 = scalar_select %p3305_p10, 1, 0 }
  0x11   : > { %s4282_s28 = scalar_select %p3309_p11, 1, 0 }
  0x12   : > { %s2705_s30 = sshll.u32 %s3222_s18, 13  ;;  %s2560_s5 = sshll.u32 %s173_s29, 9 }
  0x13   : > { %s3318_s8 = scalar_lea.hbm %s4253_s1, %s2705_s30  ;;  %s177_s9 = scalar_lea.vmem [#allocation2], %s2560_s5 }
  0x14   : > { %s184_s10 = sshll.u32 %s177_s9, 4  ;;  %p3322_p12 = pnand %p3090_p9, %p3295_p5  ;;  %s3326_s10 = int_to_ptr.vmem [resolvable:$true] %s184_s10 }
  0x15   : > { %s3328_s12 = scalar_lea.sflag [#allocation3], %s173_s29  ;;  %s3130_s13 = scalar_lea.hbm %s3318_s8, 8192 }
  0x16   : > { %p3131_p13 = scmp.ne.s32.totalorder %s3318_s8, %s3130_s13  ;;  %p3132_p0 = pneg %p3322_p12 }
  0x17   : > { %s3135_s22 = scalar_lea.hbm %s4253_s1, 32768  ;;  %p3136_p3 = scmp.lt.s32.totalorder %s3318_s8, %s4253_s1 }
  0x18   : > { %p3133_p1 = pnand %p3132_p0, %p3131_p13  ;;  %p3137_p4 = scmp.lt.s32.totalorder %s3135_s22, %s3130_s13 }
  0x1a   : > { %p3134_p2 = pneg %p3133_p1  ;;  %p3138_p5 = por %p3137_p4, %p3136_p3 }
  0x1c   : > { %p3139_p7 = pnand %p3138_p5, %p3134_p2 }
  0x1e   : > { %3142 = shalt.err (!%p3139_p7)
}
  0x1f   : > { %s3143_s29 = scalar_lea.vmem %s3326_s10, 8192  ;;  %s3224_s30 = smov [#allocation2]  }
  0x20   : > { %p3144_p8 = scmp.ne.s32.totalorder %s3326_s10, %s3143_s29  ;;  %s3148_s5 = sshll.u32 %s3224_s30, 4  ;;  %s3149_s5 = int_to_ptr.vmem [resolvable:$false] %s3148_s5 }
  0x21   : > { %s3150_s6 = scalar_lea.vmem %s3149_s5, 16384  ;;  %p3151_p1 = scmp.lt.s32.totalorder %s3326_s10, %s3149_s5 }
  0x22   : > { %p3146_p9 = pnand %p3144_p8, %p3132_p0  ;;  %p3152_p11 = scmp.lt.s32.totalorder %s3150_s6, %s3143_s29 }
  0x24   : > { %p3147_p13 = pneg %p3146_p9  ;;  %p3153_p10 = por %p3152_p11, %p3151_p1 }
  0x26   : > { %p3154_p6 = pnand %p3153_p10, %p3147_p13 }
  0x28   : > { %3157 = shalt.err (!%p3154_p6)
}
  0x29   : > { %s3225_s7 = smov 256   ;;  %s3226_s9 = smov 16  }
  0x2a   : > { %3085 = dma.hbm_to_vmem [thread:$0]  (!%p3322_p12), %s3318_s8, 8192, %s3326_s10, %s3328_s12, %s3225_s7, %s3225_s7, %s3226_s9  }
  0x2b   : > { %p2563_p0 = scmp.ge.s32.totalorder %s3222_s18, 1  ;;  %p192_p2 = scmp.lt.s32.totalorder %s3222_s18, 5 }
  0x2d   : > { %p193_p3 = pnand %p2563_p0, %p192_p2 }
  0x2f   : > { %196 = sbr.rel (%p193_p3) target bundleno = 1842 (0x732), region = 36 }
  0x34   : > { %s3352_s13 = sand.u32 1, %s3214_s16   ;;  %p4284_p6 = scmp.ne.s32.totalorder %s4280_s26, 0 }
  0x35   : > { %s2564_s14 = sshll.u32 %s3352_s13, 9  ;;  %s199_s20 = scalar_lea.sflag [#allocation3], %s3352_s13 }
  0x36   : > { %s3356_s22 = scalar_lea.vmem [#allocation2], %s2564_s14 }
  0x37   : > { %3201 = dma.done.wait (%p4284_p6), %s199_s20, 8192  }
  0x38   : > { %3203 = vsyncadd (%p4284_p6), %s199_s20, 4294959104  ;;  %s2565_s8 = sshll.u32 %s3277_s19, 5  ;;  %vm357_vm0 = vcmask 130048   ;;  %v238_v0 = vld [vmem:[%s4254_s2 + $0x8] sm:$0xff]  ;;  %v237_v1 = vld [vmem:[%s4254_s2] sm:$0xff]  ;;  %vm679_vm1 = vcmask 261120  }
  0x39   : > { %p232_p10 = scmp.lt.s32.totalorder %s2565_s8, 127  ;;  %2851 = vmatprep.subr.mxu0 %v238_v0  ;;  %v242_v9 = vld [vmem:[%s4254_s2 + $0x28] sm:$0xff]  ;;  %v241_v35 = vld [vmem:[%s4254_s2 + $0x20] sm:$0xff]  ;;  %v240_v36 = vld [vmem:[%s4254_s2 + $0x18] sm:$0xff]  ;;  %vm3228_vm2 = vmmov 0   ;;  %vm2366_vm3 = vcmask 1041409  }
  0x3a   : > { %2852 = vmatpush3.msra.mxu0 %v238_v0  ;;  %2903 = vmatprep.subr.mxu1 %v242_v9  ;;  %v239_v37 = vld [vmem:[%s4254_s2 + $0x10] sm:$0xff]  ;;  %v3453_v39 = vld [vmem:[%s4255_s3] ss:$0 sm:$0xff]  ;;  %vm2368_vm4 = vcmask 1042434   ;;  %vm2370_vm5 = vcmask 1043459   ;;  %vm2372_vm6 = vcmask 1044484  }
  0x3b   : > { %s4329_s8 = smov (!%p232_p10, %s2565_s8), 127  ;;  %2853 = vmatprep.subr.mxu0 %v237_v1  ;;  %2904 = vmatpush3.msra.mxu1 %v242_v9  ;;  %vm2374_vm7 = vcmask 1045509   ;;  %vm2376_vm8 = vcmask 1046534   ;;  %vm2378_vm9 = vcmask 1047559   ;;  %s230_s20 = scalar_lea.vmem [#allocation5], %s3352_s13  ;;  %vm2464_vm10 = vcmask 122880  }
  0x3c   : > { %s2566_s10 = sshll.u32 %s4329_s8, 3  ;;  %2854 = vmatpush3.msra.mxu0 %v237_v1  ;;  %2905 = vmatprep.subr.mxu1 %v241_v35  ;;  %s2479_s8 = sshll.u32 %s230_s20, 4  ;;  %s2480_s8 = int_to_ptr.vmem [resolvable:$true] %s2479_s8 }
  0x3d   : > { %s3366_s23 = scalar_lea.vmem %s4252_s0, %s2566_s10  ;;  %2906 = vmatpush3.msra.mxu1 %v241_v35  ;;  %s3158_s25 = scalar_lea.vmem %s2480_s8, 16 }
  0x3e   : > { %v321_v2 = vld [vmem:[%s3366_s23] sm:$0xff]  ;;  %v322_v3 = vld [vmem:[%s3366_s23 + $0x8] sm:$0xff]  ;;  %v323_v4 = vld [vmem:[%s3366_s23 + $0x10] sm:$0xff]  ;;  %2907 = vmatprep.subr.mxu1 %v240_v36  ;;  %p3159_p11 = scmp.ne.s32.totalorder %s2480_s8, %s3158_s25  ;;  %p4322_p12 = scmp.ne.s32.totalorder %s4281_s27, 0 }
  0x3f   : > { %2855 = vmatprep.mubr.msk.f32.mxu0 %vm357_vm0, %v321_v2  ;;  %v324_v5 = vld [vmem:[%s3366_s23 + $0x18] sm:$0xff]  ;;  %v325_v6 = vld [vmem:[%s3366_s23 + $0x20] sm:$0xff]  ;;  %v326_v7 = vld [vmem:[%s3366_s23 + $0x28] sm:$0xff]  ;;  %2908 = vmatpush3.msra.mxu1 %v240_v36 }
  0x40   : > { %2856 = vmatmul.mubr.msk.f32.vlgmr.msra.gmra.mxu0 %vm357_vm0, %v322_v3  ;;  %v327_v8 = vld [vmem:[%s3366_s23 + $0x30] sm:$0xff]  ;;  %v328_v10 = vld [vmem:[%s3366_s23 + $0x38] sm:$0xff]  ;;  %v329_v11 = vld [vmem:[%s3366_s23 + $0x40] sm:$0xff]  ;;  %2909 = vmatprep.subr.mxu1 %v239_v37  ;;  %p3160_p4 = pnand %p3159_p11, %p4322_p12 }
  0x41   : > { %2858 = vmatprep.mubr.msk.f32.mxu0 %vm357_vm0, %v323_v4  ;;  %v330_v12 = vld [vmem:[%s3366_s23 + $0x48] sm:$0xff]  ;;  %v331_v13 = vld [vmem:[%s3366_s23 + $0x50] sm:$0xff]  ;;  %v332_v14 = vld [vmem:[%s3366_s23 + $0x58] sm:$0xff]  ;;  %2910 = vmatpush3.msra.mxu1 %v239_v37 }
  0x42   : > { %v333_v15 = vld [vmem:[%s3366_s23 + $0x60] sm:$0xff]  ;;  %v334_v16 = vld [vmem:[%s3366_s23 + $0x68] sm:$0xff]  ;;  %v335_v17 = vld [vmem:[%s3366_s23 + $0x70] sm:$0xff]  ;;  %p3161_p5 = pneg %p3160_p4 }
  0x43   : > { %v336_v18 = vld [vmem:[%s3366_s23 + $0x78] sm:$0xff]  ;;  %v337_v19 = vld [vmem:[%s3366_s23 + $0x80] sm:$0xff]  ;;  %v338_v20 = vld [vmem:[%s3366_s23 + $0x88] sm:$0xff] }
  0x44   : > { %2859 = vmatmul.mubr.msk.f32.gmra.mxu0 %vm357_vm0, %v324_v5  ;;  %v339_v21 = vld [vmem:[%s3366_s23 + $0x90] sm:$0xff]  ;;  %v340_v22 = vld [vmem:[%s3366_s23 + $0x98] sm:$0xff]  ;;  %v341_v23 = vld [vmem:[%s3366_s23 + $0xa0] sm:$0xff] }
  0x45   : > { %2861 = vmatprep.mubr.msk.f32.mxu0 %vm357_vm0, %v325_v6  ;;  %v342_v24 = vld [vmem:[%s3366_s23 + $0xa8] sm:$0xff]  ;;  %v343_v25 = vld [vmem:[%s3366_s23 + $0xb0] sm:$0xff]  ;;  %v344_v26 = vld [vmem:[%s3366_s23 + $0xb8] sm:$0xff] }
  0x46   : > { %v345_v27 = vld [vmem:[%s3366_s23 + $0xc0] sm:$0xff]  ;;  %v346_v28 = vld [vmem:[%s3366_s23 + $0xc8] sm:$0xff]  ;;  %v347_v29 = vld [vmem:[%s3366_s23 + $0xd0] sm:$0xff] }
  0x47   : > { %v348_v30 = vld [vmem:[%s3366_s23 + $0xd8] sm:$0xff]  ;;  %v349_v31 = vld [vmem:[%s3366_s23 + $0xe0] sm:$0xff]  ;;  %v350_v32 = vld [vmem:[%s3366_s23 + $0xe8] sm:$0xff] }
  0x48   : > { %2862 = vmatmul.mubr.msk.f32.gmra.mxu0 %vm357_vm0, %v326_v7  ;;  %v351_v33 = vld [vmem:[%s3366_s23 + $0xf0] sm:$0xff]  ;;  %v352_v34 = vld [vmem:[%s3366_s23 + $0xf8] sm:$0xff]  ;;  %s2467_s23 = scalar_lea.sflag [#allocation4], %s3352_s13 }
  0x49   : > { %2864 = vmatprep.mubr.msk.f32.mxu0 %vm357_vm0, %v327_v8 }
  0x4c   : > { %2865 = vmatmul.mubr.msk.f32.gmra.mxu0 %vm357_vm0, %v328_v10 }
  0x4d   : > { %2867 = vmatprep.mubr.msk.f32.mxu0 %vm357_vm0, %v329_v11 }
  0x50   : > { %2868 = vmatmul.mubr.msk.f32.gmra.mxu0 %vm357_vm0, %v330_v12 }
  0x51   : > { %2870 = vmatprep.mubr.msk.f32.mxu0 %vm357_vm0, %v331_v13 }
  0x54   : > { %2871 = vmatmul.mubr.msk.f32.gmra.mxu0 %vm357_vm0, %v332_v14 }
  0x55   : > { %2873 = vmatprep.mubr.msk.f32.mxu0 %vm357_vm0, %v333_v15 }
  0x58   : > { %2874 = vmatmul.mubr.msk.f32.gmra.mxu0 %vm357_vm0, %v334_v16 }
  0x59   : > { %2876 = vmatprep.mubr.msk.f32.mxu0 %vm357_vm0, %v335_v17 }
  0x5c   : > { %2877 = vmatmul.mubr.msk.f32.gmra.mxu0 %vm357_vm0, %v336_v18 }
  0x5d   : > { %2879 = vmatprep.mubr.msk.f32.mxu0 %vm357_vm0, %v337_v19 }
  0x60   : > { %2880 = vmatmul.mubr.msk.f32.gmra.mxu0 %vm357_vm0, %v338_v20 }
  0x61   : > { %2882 = vmatprep.mubr.msk.f32.mxu0 %vm357_vm0, %v339_v21 }
  0x64   : > { %2883 = vmatmul.mubr.msk.f32.gmra.mxu0 %vm357_vm0, %v340_v22 }
  0x65   : > { %2885 = vmatprep.mubr.msk.f32.mxu0 %vm357_vm0, %v341_v23 }
  0x68   : > { %2886 = vmatmul.mubr.msk.f32.gmra.mxu0 %vm357_vm0, %v342_v24 }
  0x69   : > { %2888 = vmatprep.mubr.msk.f32.mxu0 %vm357_vm0, %v343_v25 }
  0x6c   : > { %2889 = vmatmul.mubr.msk.f32.gmra.mxu0 %vm357_vm0, %v344_v26 }
  0x6d   : > { %2891 = vmatprep.mubr.msk.f32.mxu0 %vm357_vm0, %v345_v27 }
  0x70   : > { %2892 = vmatmul.mubr.msk.f32.gmra.mxu0 %vm357_vm0, %v346_v28 }
  0x71   : > { %2894 = vmatprep.mubr.msk.f32.mxu0 %vm357_vm0, %v347_v29 }
  0x74   : > { %2895 = vmatmul.mubr.msk.f32.gmra.mxu0 %vm357_vm0, %v348_v30 }
  0x75   : > { %2897 = vmatprep.mubr.msk.f32.mxu0 %vm357_vm0, %v349_v31 }
  0x78   : > { %2898 = vmatmul.mubr.msk.f32.gmra.mxu0 %vm357_vm0, %v350_v32 }
  0x79   : > { %2900 = vmatprep.mubr.msk.f32.mxu0 %vm357_vm0, %v351_v33 }
  0x7c   : > { %2901 = vmatmul.mubr.msk.f32.gmra.mxu0 %vm357_vm0, %v352_v34 }
 0x100   : > { %v2857_v38 = vpop.f32.mrf.mxu0 }
 0x101   : > { %v526_v42 = vadd.f32 %v2857_v38, %v3453_v39 }
 0x102   : > { %v520_v40 = vpop.f32.mrf.mxu0 }
 0x103   : > { %v521_v41 = vadd.f32 %v3453_v39, %v520_v40  ;;  %v4259_v40 = vmov 0.0  }
 0x104   : > { %v2860_v43 = vpop.f32.mrf.mxu0  ;;  %1005 = vmatprep.subr.mxu0 %v4259_v40 }
 0x105   : > { %2911 = vmatprep.mubr.msk.f32.mxu1 %vm679_vm1, %v521_v41  ;;  %v536_v46 = vadd.f32 %v2860_v43, %v3453_v39  ;;  %v3521_v41 = vld [vmem:[%s3356_s22 + $0x8] sm:$0xff] }
 0x106   : > { %v530_v44 = vpop.f32.mrf.mxu0  ;;  %2912 = vmatmul.mubr.msk.f32.vlgmr.msra.gmra.mxu1 %vm679_vm1, %v526_v42  ;;  %1069 = vmatprep.mubr.f32.mxu0 %v3521_v41 }
 0x107   : > { %v531_v45 = vadd.f32 %v3453_v39, %v530_v44 }
 0x108   : > { %v2863_v47 = vpop.f32.mrf.mxu0 }
 0x109   : > { %2914 = vmatprep.mubr.msk.f32.mxu1 %vm679_vm1, %v531_v45  ;;  %v546_v50 = vadd.f32 %v2863_v47, %v3453_v39 }
 0x10a   : > { %v540_v48 = vpop.f32.mrf.mxu0  ;;  %2915 = vmatmul.mubr.msk.f32.gmra.mxu1 %vm679_vm1, %v536_v46 }
 0x10b   : > { %v541_v49 = vadd.f32 %v3453_v39, %v540_v48 }
 0x10c   : > { %v2866_v51 = vpop.f32.mrf.mxu0 }
 0x10d   : > { %2917 = vmatprep.mubr.msk.f32.mxu1 %vm679_vm1, %v541_v49  ;;  %v556_v54 = vadd.f32 %v2866_v51, %v3453_v39 }
 0x10e   : > { %v550_v52 = vpop.f32.mrf.mxu0  ;;  %2918 = vmatmul.mubr.msk.f32.gmra.mxu1 %vm679_vm1, %v546_v50 }
 0x10f   : > { %v551_v53 = vadd.f32 %v3453_v39, %v550_v52 }
 0x110   : > { %v2869_v55 = vpop.f32.mrf.mxu0 }
 0x111   : > { %2920 = vmatprep.mubr.msk.f32.mxu1 %vm679_vm1, %v551_v53  ;;  %v566_v58 = vadd.f32 %v2869_v55, %v3453_v39 }
 0x112   : > { %v560_v56 = vpop.f32.mrf.mxu0  ;;  %2921 = vmatmul.mubr.msk.f32.gmra.mxu1 %vm679_vm1, %v556_v54 }
 0x113   : > { %v561_v57 = vadd.f32 %v3453_v39, %v560_v56 }
 0x114   : > { %v2872_v59 = vpop.f32.mrf.mxu0 }
 0x115   : > { %2923 = vmatprep.mubr.msk.f32.mxu1 %vm679_vm1, %v561_v57  ;;  %v576_v62 = vadd.f32 %v2872_v59, %v3453_v39 }
 0x116   : > { %v570_v60 = vpop.f32.mrf.mxu0  ;;  %2924 = vmatmul.mubr.msk.f32.gmra.mxu1 %vm679_vm1, %v566_v58 }
 0x117   : > { %v571_v61 = vadd.f32 %v3453_v39, %v570_v60 }
 0x118   : > { %v2875_v63 = vpop.f32.mrf.mxu0 }
 0x119   : > { %2926 = vmatprep.mubr.msk.f32.mxu1 %vm679_vm1, %v571_v61  ;;  %v586_v2 = vadd.f32 %v2875_v63, %v3453_v39 }
 0x11a   : > { %v580_v0 = vpop.f32.mrf.mxu0  ;;  %2927 = vmatmul.mubr.msk.f32.gmra.mxu1 %vm679_vm1, %v576_v62 }
 0x11b   : > { %v581_v1 = vadd.f32 %v3453_v39, %v580_v0 }
 0x11c   : > { %v2878_v3 = vpop.f32.mrf.mxu0 }
 0x11d   : > { %2929 = vmatprep.mubr.msk.f32.mxu1 %vm679_vm1, %v581_v1  ;;  %v596_v6 = vadd.f32 %v2878_v3, %v3453_v39 }
 0x11e   : > { %v590_v4 = vpop.f32.mrf.mxu0  ;;  %2930 = vmatmul.mubr.msk.f32.gmra.mxu1 %vm679_vm1, %v586_v2 }
 0x11f   : > { %v591_v5 = vadd.f32 %v3453_v39, %v590_v4 }
 0x120   : > { %v2881_v7 = vpop.f32.mrf.mxu0 }
 0x121   : > { %2932 = vmatprep.mubr.msk.f32.mxu1 %vm679_vm1, %v591_v5  ;;  %v606_v10 = vadd.f32 %v2881_v7, %v3453_v39 }
 0x122   : > { %v600_v8 = vpop.f32.mrf.mxu0  ;;  %2933 = vmatmul.mubr.msk.f32.gmra.mxu1 %vm679_vm1, %v596_v6 }
 0x123   : > { %v601_v9 = vadd.f32 %v3453_v39, %v600_v8 }
 0x124   : > { %v2884_v11 = vpop.f32.mrf.mxu0 }
 0x125   : > { %2935 = vmatprep.mubr.msk.f32.mxu1 %vm679_vm1, %v601_v9  ;;  %v616_v14 = vadd.f32 %v2884_v11, %v3453_v39  ;;  %v3560_v9 = vld [vmem:[%s3356_s22] sm:$0xff]  ;;  %v3570_v11 = vld [vmem:[%s3356_s22 + $0x10] sm:$0xff] }
 0x126   : > { %v610_v12 = vpop.f32.mrf.mxu0  ;;  %2936 = vmatmul.mubr.msk.f32.gmra.mxu1 %vm679_vm1, %v606_v10  ;;  %v3564_v10 = vld [vmem:[%s3356_s22 + $0x18] sm:$0xff] }
 0x127   : > { %v611_v13 = vadd.f32 %v3453_v39, %v610_v12  ;;  %v3573_v12 = vld [vmem:[%s3356_s22 + $0x28] sm:$0xff] }
 0x128   : > { %v2887_v15 = vpop.f32.mrf.mxu0 }
 0x129   : > { %2938 = vmatprep.mubr.msk.f32.mxu1 %vm679_vm1, %v611_v13  ;;  %v626_v18 = vadd.f32 %v2887_v15, %v3453_v39  ;;  %v3578_v13 = vld [vmem:[%s3356_s22 + $0x20] sm:$0xff]  ;;  %v3586_v15 = vld [vmem:[%s3356_s22 + $0x30] sm:$0xff] }
 0x12a   : > { %v620_v16 = vpop.f32.mrf.mxu0  ;;  %2939 = vmatmul.mubr.msk.f32.gmra.mxu1 %vm679_vm1, %v616_v14  ;;  %v3581_v14 = vld [vmem:[%s3356_s22 + $0x38] sm:$0xff] }
 0x12b   : > { %v621_v17 = vadd.f32 %v3453_v39, %v620_v16  ;;  %v3589_v16 = vld [vmem:[%s3356_s22 + $0x48] sm:$0xff] }
 0x12c   : > { %v2890_v19 = vpop.f32.mrf.mxu0 }
 0x12d   : > { %2941 = vmatprep.mubr.msk.f32.mxu1 %vm679_vm1, %v621_v17  ;;  %v636_v22 = vadd.f32 %v2890_v19, %v3453_v39  ;;  %v3594_v17 = vld [vmem:[%s3356_s22 + $0x40] sm:$0xff]  ;;  %v3602_v19 = vld [vmem:[%s3356_s22 + $0x50] sm:$0xff] }
 0x12e   : > { %v630_v20 = vpop.f32.mrf.mxu0  ;;  %2942 = vmatmul.mubr.msk.f32.gmra.mxu1 %vm679_vm1, %v626_v18  ;;  %v3597_v18 = vld [vmem:[%s3356_s22 + $0x58] sm:$0xff] }
 0x12f   : > { %v631_v21 = vadd.f32 %v3453_v39, %v630_v20  ;;  %v3605_v20 = vld [vmem:[%s3356_s22 + $0x68] sm:$0xff] }
 0x130   : > { %v2893_v23 = vpop.f32.mrf.mxu0 }
 0x131   : > { %2944 = vmatprep.mubr.msk.f32.mxu1 %vm679_vm1, %v631_v21  ;;  %v646_v26 = vadd.f32 %v2893_v23, %v3453_v39  ;;  %v3610_v21 = vld [vmem:[%s3356_s22 + $0x60] sm:$0xff]  ;;  %v3618_v23 = vld [vmem:[%s3356_s22 + $0x70] sm:$0xff] }
 0x132   : > { %v640_v24 = vpop.f32.mrf.mxu0  ;;  %2945 = vmatmul.mubr.msk.f32.gmra.mxu1 %vm679_vm1, %v636_v22  ;;  %v3613_v22 = vld [vmem:[%s3356_s22 + $0x78] sm:$0xff] }
 0x133   : > { %v641_v25 = vadd.f32 %v3453_v39, %v640_v24  ;;  %v3621_v24 = vld [vmem:[%s3356_s22 + $0x88] sm:$0xff] }
 0x134   : > { %v2896_v27 = vpop.f32.mrf.mxu0 }
 0x135   : > { %2947 = vmatprep.mubr.msk.f32.mxu1 %vm679_vm1, %v641_v25  ;;  %v656_v30 = vadd.f32 %v2896_v27, %v3453_v39  ;;  %v3626_v25 = vld [vmem:[%s3356_s22 + $0x80] sm:$0xff]  ;;  %v3634_v27 = vld [vmem:[%s3356_s22 + $0x90] sm:$0xff] }
 0x136   : > { %v650_v28 = vpop.f32.mrf.mxu0  ;;  %2948 = vmatmul.mubr.msk.f32.gmra.mxu1 %vm679_vm1, %v646_v26  ;;  %v3629_v26 = vld [vmem:[%s3356_s22 + $0x98] sm:$0xff] }
 0x137   : > { %v651_v29 = vadd.f32 %v3453_v39, %v650_v28  ;;  %v3637_v28 = vld [vmem:[%s3356_s22 + $0xa8] sm:$0xff] }
 0x138   : > { %v2899_v31 = vpop.f32.mrf.mxu0 }
 0x139   : > { %2950 = vmatprep.mubr.msk.f32.mxu1 %vm679_vm1, %v651_v29  ;;  %v666_v34 = vadd.f32 %v2899_v31, %v3453_v39  ;;  %v3642_v29 = vld [vmem:[%s3356_s22 + $0xa0] sm:$0xff]  ;;  %v3650_v31 = vld [vmem:[%s3356_s22 + $0xb0] sm:$0xff] }
 0x13a   : > { %v660_v32 = vpop.f32.mrf.mxu0  ;;  %2951 = vmatmul.mubr.msk.f32.gmra.mxu1 %vm679_vm1, %v656_v30  ;;  %v3645_v30 = vld [vmem:[%s3356_s22 + $0xb8] sm:$0xff] }
 0x13b   : > { %v661_v33 = vadd.f32 %v3453_v39, %v660_v32  ;;  %v3653_v32 = vld [vmem:[%s3356_s22 + $0xc8] sm:$0xff] }
 0x13c   : > { %v2902_v35 = vpop.f32.mrf.mxu0 }
 0x13d   : > { %2953 = vmatprep.mubr.msk.f32.mxu1 %vm679_vm1, %v661_v33  ;;  %v676_v38 = vadd.f32 %v2902_v35, %v3453_v39  ;;  %v3658_v33 = vld [vmem:[%s3356_s22 + $0xc0] sm:$0xff]  ;;  %v3666_v35 = vld [vmem:[%s3356_s22 + $0xd0] sm:$0xff] }
 0x13e   : > { %v670_v36 = vpop.f32.mrf.mxu0  ;;  %2954 = vmatmul.mubr.msk.f32.gmra.mxu1 %vm679_vm1, %v666_v34  ;;  %v3661_v34 = vld [vmem:[%s3356_s22 + $0xd8] sm:$0xff] }
 0x13f   : > { %v671_v37 = vadd.f32 %v3453_v39, %v670_v36  ;;  %v3669_v36 = vld [vmem:[%s3356_s22 + $0xe8] sm:$0xff] }
 0x141   : > { %2956 = vmatprep.mubr.msk.f32.mxu1 %vm679_vm1, %v671_v37  ;;  %v3674_v37 = vld [vmem:[%s3356_s22 + $0xe0] sm:$0xff] }
 0x142   : > { %2957 = vmatmul.mubr.msk.f32.gmra.mxu1 %vm679_vm1, %v676_v38  ;;  %v3677_v38 = vld [vmem:[%s3356_s22 + $0xf8] sm:$0xff] }
 0x1c6   : > { %v2913_v42 = vpop.f32.mrf.mxu1 }
 0x1c8   : > { %v842_v43 = vpop.f32.mrf.mxu1 }
 0x1ca   : > { %v2916_v44 = vpop.f32.mrf.mxu1 }
 0x1cc   : > { %v852_v45 = vpop.f32.mrf.mxu1 }
 0x1ce   : > { %v2919_v46 = vpop.f32.mrf.mxu1 }
 0x1d0   : > { %v862_v47 = vpop.f32.mrf.mxu1 }
 0x1d2   : > { %v2922_v48 = vpop.f32.mrf.mxu1 }
 0x1d4   : > { %v872_v49 = vpop.f32.mrf.mxu1 }
 0x1d6   : > { %v2925_v39 = vpop.f32.mrf.mxu1 }
 0x1d8   : > { %v882_v50 = vpop.f32.mrf.mxu1 }
 0x1da   : > { %v2928_v51 = vpop.f32.mrf.mxu1 }
 0x1dc   : > { %v892_v52 = vpop.f32.mrf.mxu1 }
 0x1de   : > { %v2931_v53 = vpop.f32.mrf.mxu1 }
 0x1e0   : > { %v902_v54 = vpop.f32.mrf.mxu1 }
 0x1e2   : > { %v2934_v55 = vpop.f32.mrf.mxu1 }
 0x1e3   : > { %1006 = vmatpush1.msra.mxu0 %v2934_v55  ;;  %v3735_v55 = vld [vmem:[%s3356_s22 + $0x140] sm:$0xff] }
 0x1e4   : > { %v912_v56 = vpop.f32.mrf.mxu1  ;;  %1007 = vmatprep.subr.mxu0 %v4259_v40 }
 0x1e5   : > { %1008 = vmatpush1.msra.mxu0 %v912_v56  ;;  %v3738_v56 = vld [vmem:[%s3356_s22 + $0x158] sm:$0xff] }
 0x1e6   : > { %v3525_v57 = vpop.f32.mrf.mxu1  ;;  %1009 = vmatprep.subr.mxu0 %v4259_v40 }
 0x1e7   : > { %1010 = vmatpush1.msra.mxu0 %v2931_v53  ;;  %v3726_v53 = vld [vmem:[%s3356_s22 + $0x130] sm:$0xff] }
 0x1e8   : > { %v3528_v58 = vpop.f32.mrf.mxu1  ;;  %1011 = vmatprep.subr.mxu0 %v4259_v40 }
 0x1e9   : > { %1012 = vmatpush1.msra.mxu0 %v902_v54  ;;  %v3730_v54 = vld [vmem:[%s3356_s22 + $0x148] sm:$0xff] }
 0x1ea   : > { %v2940_v59 = vpop.f32.mrf.mxu1  ;;  %1013 = vmatprep.subr.mxu0 %v4259_v40 }
 0x1eb   : > { %1014 = vmatpush1.msra.mxu0 %v2928_v51  ;;  %v3718_v51 = vld [vmem:[%s3356_s22 + $0x138] sm:$0xff] }
 0x1ec   : > { %v932_v60 = vpop.f32.mrf.mxu1  ;;  %1015 = vmatprep.subr.mxu0 %v4259_v40 }
 0x1ed   : > { %1016 = vmatpush1.msra.mxu0 %v892_v52  ;;  %v243_v52 = vld [vmem:[%s4254_s2 + $0x30] sm:$0xff] }
 0x1ee   : > { %v2943_v61 = vpop.f32.mrf.mxu1  ;;  %1017 = vmatprep.subr.mxu0 %v4259_v40 }
 0x1ef   : > { %1018 = vmatpush1.msra.mxu0 %v2925_v39  ;;  %v244_v39 = vld [vmem:[%s4254_s2 + $0x38] sm:$0xff] }
 0x1f0   : > { %v942_v62 = vpop.f32.mrf.mxu1  ;;  %1019 = vmatprep.subr.mxu0 %v4259_v40 }
 0x1f1   : > { %1020 = vmatpush1.msra.mxu0 %v882_v50  ;;  %v3715_v50 = vld [vmem:[%s3356_s22 + $0x120] sm:$0xff] }
 0x1f2   : > { %v2946_v63 = vpop.f32.mrf.mxu1  ;;  %1021 = vmatprep.subr.mxu0 %v4259_v40 }
 0x1f3   : > { %1022 = vmatpush1.msra.mxu0 %v2922_v48  ;;  %v3704_v48 = vld [vmem:[%s3356_s22 + $0x128] sm:$0xff] }
 0x1f4   : > { %v952_v0 = vpop.f32.mrf.mxu1  ;;  %1023 = vmatprep.subr.mxu0 %v4259_v40 }
 0x1f5   : > { %1024 = vmatpush1.msra.mxu0 %v872_v49  ;;  %v245_v49 = vld [vmem:[%s4254_s2 + $0x40] sm:$0xff] }
 0x1f6   : > { %v2949_v1 = vpop.f32.mrf.mxu1  ;;  %1025 = vmatprep.subr.mxu0 %v4259_v40 }
 0x1f7   : > { %1026 = vmatpush1.msra.mxu0 %v2919_v46  ;;  %v246_v46 = vld [vmem:[%s4254_s2 + $0x48] sm:$0xff] }
 0x1f8   : > { %v962_v2 = vpop.f32.mrf.mxu1  ;;  %1027 = vmatprep.subr.mxu0 %v4259_v40  ;;  %2959 = vmatprep.subr.mxu1 %v246_v46 }
 0x1f9   : > { %1028 = vmatpush1.msra.mxu0 %v862_v47  ;;  %v3701_v47 = vld [vmem:[%s3356_s22 + $0x110] sm:$0xff]  ;;  %2960 = vmatpush3.msra.mxu1 %v246_v46 }
 0x1fa   : > { %v2952_v3 = vpop.f32.mrf.mxu1  ;;  %1029 = vmatprep.subr.mxu0 %v4259_v40  ;;  %2961 = vmatprep.subr.mxu1 %v245_v49  ;;  %v3807_v46 = vld [vmem:[%s3356_s22 + $0x1d0] sm:$0xff] }
 0x1fb   : > { %1030 = vmatpush1.msra.mxu0 %v2916_v44  ;;  %v3690_v44 = vld [vmem:[%s3356_s22 + $0x100] sm:$0xff]  ;;  %2962 = vmatpush3.msra.mxu1 %v245_v49  ;;  %4298 = vst [vmem:[#allocation21_spill] sm:$0xff] %v3807_v46  ;;  %v3810_v49 = vld [vmem:[%s3356_s22 + $0x1e8] sm:$0xff] }
 0x1fc   : > { %v972_v4 = vpop.f32.mrf.mxu1  ;;  %1031 = vmatprep.subr.mxu0 %v4259_v40  ;;  %2963 = vmatprep.subr.mxu1 %v244_v39  ;;  %4299 = vst [vmem:[#allocation22_spill] sm:$0xff] %v3810_v49 }
 0x1fd   : > { %1032 = vmatpush1.msra.mxu0 %v852_v45  ;;  %v3693_v45 = vld [vmem:[%s3356_s22 + $0x118] sm:$0xff]  ;;  %2964 = vmatpush3.msra.mxu1 %v244_v39  ;;  %v3815_v39 = vld [vmem:[%s3356_s22 + $0x1e0] sm:$0xff] }
 0x1fe   : > { %v2955_v5 = vpop.f32.mrf.mxu1  ;;  %1033 = vmatprep.subr.mxu0 %v4259_v40  ;;  %2965 = vmatprep.subr.mxu1 %v243_v52  ;;  %4300 = vst [vmem:[#allocation23_spill] sm:$0xff] %v3815_v39 }
 0x1ff   : > { %1034 = vmatpush1.msra.mxu0 %v2913_v42  ;;  %v3682_v42 = vld [vmem:[%s3356_s22 + $0xf0] sm:$0xff]  ;;  %2966 = vmatpush3.msra.mxu1 %v243_v52  ;;  %v3818_v52 = vld [vmem:[%s3356_s22 + $0x1f8] sm:$0xff] }
 0x200   : > { %v982_v6 = vpop.f32.mrf.mxu1  ;;  %1035 = vmatprep.subr.mxu0 %v4259_v40  ;;  %1587 = vmatprep.subr.mxu1 %v4259_v40  ;;  %4301 = vst [vmem:[#allocation24_spill] sm:$0xff] %v3818_v52 }
 0x201   : > { %1036 = vmatpush1.msra.mxu0 %v842_v43  ;;  %v3685_v43 = vld [vmem:[%s3356_s22 + $0x108] sm:$0xff] }
 0x202   : > { %v2958_v7 = vpop.f32.mrf.mxu1  ;;  %1037 = vmatprep.subr.mxu0 %v4259_v40 }
 0x203   : > { %1038 = vmatpush2.msra.mxu0 %v2958_v7  ;;  %v3799_v7 = vld [vmem:[%s3356_s22 + $0x1c0] sm:$0xff] }
 0x204   : > { %v992_v8 = vpop.f32.mrf.mxu1  ;;  %1039 = vmatprep.subr.mxu0 %v4259_v40  ;;  %4296 = vst [vmem:[#allocation19_spill] sm:$0xff] %v3799_v7 }
 0x205   : > { %1040 = vmatpush2.msra.mxu0 %v992_v8  ;;  %v3802_v8 = vld [vmem:[%s3356_s22 + $0x1d8] sm:$0xff] }
 0x206   : > { %1041 = vmatprep.subr.mxu0 %v4259_v40  ;;  %4297 = vst [vmem:[#allocation20_spill] sm:$0xff] %v3802_v8 }
 0x207   : > { %1042 = vmatpush2.msra.mxu0 %v2955_v5  ;;  %v3791_v5 = vld [vmem:[%s3356_s22 + $0x1b0] sm:$0xff] }
 0x208   : > { %1043 = vmatprep.subr.mxu0 %v4259_v40  ;;  %4294 = vst [vmem:[#allocation17_spill] sm:$0xff] %v3791_v5 }
 0x209   : > { %1044 = vmatpush2.msra.mxu0 %v982_v6  ;;  %v3794_v6 = vld [vmem:[%s3356_s22 + $0x1c8] sm:$0xff] }
 0x20a   : > { %1045 = vmatprep.subr.mxu0 %v4259_v40  ;;  %4295 = vst [vmem:[#allocation18_spill] sm:$0xff] %v3794_v6 }
 0x20b   : > { %1046 = vmatpush2.msra.mxu0 %v2952_v3  ;;  %v3783_v3 = vld [vmem:[%s3356_s22 + $0x1a0] sm:$0xff] }
 0x20c   : > { %1047 = vmatprep.subr.mxu0 %v4259_v40  ;;  %4292 = vst [vmem:[#allocation15_spill] sm:$0xff] %v3783_v3 }
 0x20d   : > { %1048 = vmatpush2.msra.mxu0 %v972_v4  ;;  %v3786_v4 = vld [vmem:[%s3356_s22 + $0x1b8] sm:$0xff] }
 0x20e   : > { %1049 = vmatprep.subr.mxu0 %v4259_v40  ;;  %4293 = vst [vmem:[#allocation16_spill] sm:$0xff] %v3786_v4 }
 0x20f   : > { %1050 = vmatpush2.msra.mxu0 %v2949_v1  ;;  %v3775_v1 = vld [vmem:[%s3356_s22 + $0x190] sm:$0xff] }
 0x210   : > { %1051 = vmatprep.subr.mxu0 %v4259_v40  ;;  %4290 = vst [vmem:[#allocation13_spill] sm:$0xff] %v3775_v1 }
 0x211   : > { %1052 = vmatpush2.msra.mxu0 %v962_v2  ;;  %v3778_v2 = vld [vmem:[%s3356_s22 + $0x1a8] sm:$0xff] }
 0x212   : > { %1053 = vmatprep.subr.mxu0 %v4259_v40  ;;  %4291 = vst [vmem:[#allocation14_spill] sm:$0xff] %v3778_v2 }
 0x213   : > { %1054 = vmatpush2.msra.mxu0 %v2946_v63  ;;  %v3767_v63 = vld [vmem:[%s3356_s22 + $0x180] sm:$0xff] }
 0x214   : > { %1055 = vmatprep.subr.mxu0 %v4259_v40  ;;  %4288 = vst [vmem:[#allocation11_spill] sm:$0xff] %v3767_v63 }
 0x215   : > { %1056 = vmatpush2.msra.mxu0 %v952_v0  ;;  %v3770_v0 = vld [vmem:[%s3356_s22 + $0x198] sm:$0xff] }
 0x216   : > { %1057 = vmatprep.subr.mxu0 %v4259_v40  ;;  %4289 = vst [vmem:[#allocation12_spill] sm:$0xff] %v3770_v0 }
 0x217   : > { %1058 = vmatpush2.msra.mxu0 %v2943_v61  ;;  %v3759_v61 = vld [vmem:[%s3356_s22 + $0x170] sm:$0xff] }
 0x218   : > { %1059 = vmatprep.subr.mxu0 %v4259_v40  ;;  %4286 = vst [vmem:[#allocation9_spill] sm:$0xff] %v3759_v61 }
 0x219   : > { %1060 = vmatpush2.msra.mxu0 %v942_v62  ;;  %v3762_v62 = vld [vmem:[%s3356_s22 + $0x188] sm:$0xff] }
 0x21a   : > { %1061 = vmatprep.subr.mxu0 %v4259_v40  ;;  %4287 = vst [vmem:[#allocation10_spill] sm:$0xff] %v3762_v62 }
 0x21b   : > { %1062 = vmatpush2.msra.mxu0 %v2940_v59  ;;  %v3751_v59 = vld [vmem:[%s3356_s22 + $0x160] sm:$0xff] }
 0x21c   : > { %1063 = vmatprep.subr.mxu0 %v4259_v40 }
 0x21d   : > { %1064 = vmatpush2.msra.mxu0 %v932_v60  ;;  %v3754_v60 = vld [vmem:[%s3356_s22 + $0x178] sm:$0xff] }
 0x21e   : > { %1065 = vmatprep.subr.mxu0 %v4259_v40  ;;  %4285 = vst [vmem:[#allocation8_spill] sm:$0xff] %v3754_v60 }
 0x21f   : > { %1066 = vmatpush2.msra.mxu0 %v3525_v57  ;;  %v3743_v57 = vld [vmem:[%s3356_s22 + $0x150] sm:$0xff] }
 0x220   : > { %1067 = vmatprep.subr.mxu0 %v4259_v40  ;;  %v3823_v40 = vld [vmem:[%s3356_s22 + $0x1f0] sm:$0xff] }
 0x221   : > { %1068 = vmatpush2.msra.mxu0 %v3528_v58  ;;  %v3746_v58 = vld [vmem:[%s3356_s22 + $0x168] sm:$0xff]  ;;  %4302 = vst [vmem:[#allocation25_spill] sm:$0xff] %v3823_v40  ;;  %s2702_s22 = sshll.u32 %s3277_s19, 4  ;;  %s3230_s19 = smov [#allocation5]  }
 0x222   : > { %1070 = vmatmul.mubr.f32.vlgmr.msra.gmra.mxu0 %v3560_v9  ;;  %s4216_s12 = scalar_lea.hbm %s4256_s4, %s2702_s22  ;;  %s3162_s29 = sshll.u32 %s3230_s19, 4  ;;  %s3163_s29 = int_to_ptr.vmem [resolvable:$false] %s3162_s29 }
 0x223   : > { %1074 = vmatprep.mubr.f32.mxu0 %v3564_v10  ;;  %s3164_s26 = scalar_lea.vmem %s3163_s29, 32  ;;  %p3165_p7 = scmp.lt.s32.totalorder %s2480_s8, %s3163_s29 }
 0x224   : > { %p3166_p8 = scmp.lt.s32.totalorder %s3164_s26, %s3158_s25 }
 0x226   : > { %1075 = vmatmul.mubr.f32.gmra.mxu0 %v3570_v11  ;;  %p3167_p9 = por %p3166_p8, %p3165_p7 }
 0x227   : > { %1079 = vmatprep.mubr.f32.mxu0 %v3573_v12 }
 0x228   : > { %p3168_p13 = pnand %p3167_p9, %p3161_p5 }
 0x22a   : > { %1080 = vmatmul.mubr.f32.gmra.mxu0 %v3578_v13 }
 0x22b   : > { %1084 = vmatprep.mubr.f32.mxu0 %v3581_v14 }
 0x22e   : > { %1085 = vmatmul.mubr.f32.gmra.mxu0 %v3586_v15 }
 0x22f   : > { %1089 = vmatprep.mubr.f32.mxu0 %v3589_v16 }
 0x232   : > { %1090 = vmatmul.mubr.f32.gmra.mxu0 %v3594_v17 }
 0x233   : > { %1094 = vmatprep.mubr.f32.mxu0 %v3597_v18 }
 0x236   : > { %1095 = vmatmul.mubr.f32.gmra.mxu0 %v3602_v19 }
 0x237   : > { %1099 = vmatprep.mubr.f32.mxu0 %v3605_v20 }
 0x23a   : > { %1100 = vmatmul.mubr.f32.gmra.mxu0 %v3610_v21 }
 0x23b   : > { %1104 = vmatprep.mubr.f32.mxu0 %v3613_v22 }
 0x23e   : > { %1105 = vmatmul.mubr.f32.gmra.mxu0 %v3618_v23 }
 0x23f   : > { %1109 = vmatprep.mubr.f32.mxu0 %v3621_v24 }
 0x242   : > { %1110 = vmatmul.mubr.f32.gmra.mxu0 %v3626_v25 }
 0x243   : > { %1114 = vmatprep.mubr.f32.mxu0 %v3629_v26 }
 0x246   : > { %1115 = vmatmul.mubr.f32.gmra.mxu0 %v3634_v27 }
 0x247   : > { %1119 = vmatprep.mubr.f32.mxu0 %v3637_v28 }
 0x24a   : > { %1120 = vmatmul.mubr.f32.gmra.mxu0 %v3642_v29 }
 0x24b   : > { %1124 = vmatprep.mubr.f32.mxu0 %v3645_v30 }
 0x24e   : > { %1125 = vmatmul.mubr.f32.gmra.mxu0 %v3650_v31 }
 0x24f   : > { %1129 = vmatprep.mubr.f32.mxu0 %v3653_v32 }
 0x252   : > { %1130 = vmatmul.mubr.f32.gmra.mxu0 %v3658_v33 }
 0x253   : > { %1134 = vmatprep.mubr.f32.mxu0 %v3661_v34 }
 0x256   : > { %1135 = vmatmul.mubr.f32.gmra.mxu0 %v3666_v35 }
 0x257   : > { %1139 = vmatprep.mubr.f32.mxu0 %v3669_v36 }
 0x25a   : > { %1140 = vmatmul.mubr.f32.gmra.mxu0 %v3674_v37 }
 0x25b   : > { %1144 = vmatprep.mubr.f32.mxu0 %v3677_v38 }
 0x25e   : > { %1145 = vmatmul.mubr.f32.gmra.mxu0 %v3682_v42 }
 0x25f   : > { %1149 = vmatprep.mubr.f32.mxu0 %v3685_v43 }
 0x262   : > { %1150 = vmatmul.mubr.f32.gmra.mxu0 %v3690_v44 }
 0x263   : > { %1154 = vmatprep.mubr.f32.mxu0 %v3693_v45 }
 0x266   : > { %1155 = vmatmul.mubr.f32.gmra.mxu0 %v3701_v47 }
 0x267   : > { %1159 = vmatprep.mubr.f32.mxu0 %v3704_v48 }
 0x26a   : > { %1160 = vmatmul.mubr.f32.gmra.mxu0 %v3715_v50 }
 0x26b   : > { %1164 = vmatprep.mubr.f32.mxu0 %v3718_v51 }
 0x26e   : > { %1165 = vmatmul.mubr.f32.gmra.mxu0 %v3726_v53 }
 0x26f   : > { %1169 = vmatprep.mubr.f32.mxu0 %v3730_v54 }
 0x272   : > { %1170 = vmatmul.mubr.f32.gmra.mxu0 %v3735_v55 }
 0x273   : > { %1174 = vmatprep.mubr.f32.mxu0 %v3738_v56 }
 0x276   : > { %1175 = vmatmul.mubr.f32.gmra.mxu0 %v3743_v57 }
 0x277   : > { %1179 = vmatprep.mubr.f32.mxu0 %v3746_v58 }
 0x27a   : > { %1180 = vmatmul.mubr.f32.gmra.mxu0 %v3751_v59 }
 0x27b   : > { %1184 = vmatprep.mubr.f32.mxu0 %v3754_v60 }
 0x27e   : > { %1185 = vmatmul.mubr.f32.gmra.mxu0 %v3759_v61 }
 0x27f   : > { %1189 = vmatprep.mubr.f32.mxu0 %v3762_v62 }
 0x282   : > { %1190 = vmatmul.mubr.f32.gmra.mxu0 %v3767_v63 }
 0x283   : > { %1194 = vmatprep.mubr.f32.mxu0 %v3770_v0 }
 0x286   : > { %1195 = vmatmul.mubr.f32.gmra.mxu0 %v3775_v1 }
 0x287   : > { %1199 = vmatprep.mubr.f32.mxu0 %v3778_v2 }
 0x28a   : > { %1200 = vmatmul.mubr.f32.gmra.mxu0 %v3783_v3 }
 0x28b   : > { %1204 = vmatprep.mubr.f32.mxu0 %v3786_v4 }
 0x28e   : > { %1205 = vmatmul.mubr.f32.gmra.mxu0 %v3791_v5 }
 0x28f   : > { %1209 = vmatprep.mubr.f32.mxu0 %v3794_v6 }
 0x292   : > { %1210 = vmatmul.mubr.f32.gmra.mxu0 %v3799_v7 }
 0x293   : > { %1214 = vmatprep.mubr.f32.mxu0 %v3802_v8  ;;  %v3829_v8 = vld [vmem:[%s4255_s3 + $0x1] ss:$0 sm:$0xff] }
 0x296   : > { %1215 = vmatmul.mubr.f32.gmra.mxu0 %v3807_v46 }
 0x297   : > { %1219 = vmatprep.mubr.f32.mxu0 %v3810_v49 }
 0x29a   : > { %1220 = vmatmul.mubr.f32.gmra.mxu0 %v3815_v39 }
 0x29b   : > { %1224 = vmatprep.mubr.f32.mxu0 %v3818_v52 }
 0x29e   : > { %1225 = vmatmul.mubr.f32.gmra.mxu0 %v3823_v40 }
 0x2e2   : > { %v1071_v46 = vpop.f32.mrf.mxu0 }
 0x2e3   : > { %v1072_v49 = vadd.f32 %v3829_v8, %v1071_v46 }
 0x2e4   : > { %v1073_v7 = vpop.f32.mrf.mxu0 }
 0x2e5   : > { %v1230_v6 = vmax.f32 %v1072_v49, 0.0 }
 0x2e6   : > { %v1076_v5 = vpop.f32.mrf.mxu0 }
 0x2e7   : > { %v1077_v4 = vadd.f32 %v3829_v8, %v1076_v5  ;;  %2967 = vmatprep.mubr.msk.f32.mxu1 %vm679_vm1, %v1230_v6 }
 0x2e8   : > { %v1078_v52 = vpop.f32.mrf.mxu0 }
 0x2e9   : > { %v1231_v39 = vmax.f32 %v1077_v4, 0.0 }
 0x2ea   : > { %v1081_v3 = vpop.f32.mrf.mxu0 }
 0x2eb   : > { %v1082_v40 = vadd.f32 %v3829_v8, %v1081_v3  ;;  %2968 = vmatmul.mubr.msk.f32.vlgmr.msra.gmra.mxu1 %vm679_vm1, %v1231_v39 }
 0x2ec   : > { %v1083_v2 = vpop.f32.mrf.mxu0 }
 0x2ed   : > { %v1232_v1 = vmax.f32 %v1082_v40, 0.0 }
 0x2ee   : > { %v1086_v0 = vpop.f32.mrf.mxu0 }
 0x2ef   : > { %v1087_v63 = vadd.f32 %v3829_v8, %v1086_v0  ;;  %2970 = vmatprep.mubr.msk.f32.mxu1 %vm679_vm1, %v1232_v1 }
 0x2f0   : > { %v1088_v7 = vpop.f32.mrf.mxu0 }
 0x2f1   : > { %v1233_v46 = vmax.f32 %v1087_v63, 0.0 }
 0x2f2   : > { %v1091_v49 = vpop.f32.mrf.mxu0 }
 0x2f3   : > { %v1092_v5 = vadd.f32 %v3829_v8, %v1091_v49  ;;  %2971 = vmatmul.mubr.msk.f32.gmra.mxu1 %vm679_vm1, %v1233_v46 }
 0x2f4   : > { %v1093_v4 = vpop.f32.mrf.mxu0 }
 0x2f5   : > { %v1234_v6 = vmax.f32 %v1092_v5, 0.0 }
 0x2f6   : > { %v1096_v52 = vpop.f32.mrf.mxu0 }
 0x2f7   : > { %v1097_v3 = vadd.f32 %v3829_v8, %v1096_v52  ;;  %2973 = vmatprep.mubr.msk.f32.mxu1 %vm679_vm1, %v1234_v6 }
 0x2f8   : > { %v1098_v40 = vpop.f32.mrf.mxu0 }
 0x2f9   : > { %v1235_v2 = vmax.f32 %v1097_v3, 0.0 }
 0x2fa   : > { %v1101_v39 = vpop.f32.mrf.mxu0 }
 0x2fb   : > { %v1102_v0 = vadd.f32 %v3829_v8, %v1101_v39  ;;  %2974 = vmatmul.mubr.msk.f32.gmra.mxu1 %vm679_vm1, %v1235_v2 }
 0x2fc   : > { %v1103_v63 = vpop.f32.mrf.mxu0 }
 0x2fd   : > { %v1236_v1 = vmax.f32 %v1102_v0, 0.0 }
 0x2fe   : > { %v1106_v7 = vpop.f32.mrf.mxu0 }
 0x2ff   : > { %v1107_v49 = vadd.f32 %v3829_v8, %v1106_v7  ;;  %2976 = vmatprep.mubr.msk.f32.mxu1 %vm679_vm1, %v1236_v1 }
 0x300   : > { %v1108_v46 = vpop.f32.mrf.mxu0 }
 0x301   : > { %v1237_v5 = vmax.f32 %v1107_v49, 0.0 }
 0x302   : > { %v1111_v4 = vpop.f32.mrf.mxu0 }
 0x303   : > { %v1112_v52 = vadd.f32 %v3829_v8, %v1111_v4  ;;  %2977 = vmatmul.mubr.msk.f32.gmra.mxu1 %vm679_vm1, %v1237_v5 }
 0x304   : > { %v1113_v6 = vpop.f32.mrf.mxu0 }
 0x305   : > { %v1238_v3 = vmax.f32 %v1112_v52, 0.0 }
 0x306   : > { %v1116_v40 = vpop.f32.mrf.mxu0 }
 0x307   : > { %v1117_v39 = vadd.f32 %v3829_v8, %v1116_v40  ;;  %2979 = vmatprep.mubr.msk.f32.mxu1 %vm679_vm1, %v1238_v3 }
 0x308   : > { %v1118_v2 = vpop.f32.mrf.mxu0 }
 0x309   : > { %v1239_v0 = vmax.f32 %v1117_v39, 0.0 }
 0x30a   : > { %v1121_v63 = vpop.f32.mrf.mxu0 }
 0x30b   : > { %v1122_v7 = vadd.f32 %v3829_v8, %v1121_v63  ;;  %2980 = vmatmul.mubr.msk.f32.gmra.mxu1 %vm679_vm1, %v1239_v0 }
 0x30c   : > { %v1123_v1 = vpop.f32.mrf.mxu0 }
 0x30d   : > { %v1240_v49 = vmax.f32 %v1122_v7, 0.0 }
 0x30e   : > { %v1126_v46 = vpop.f32.mrf.mxu0 }
 0x30f   : > { %v1127_v4 = vadd.f32 %v3829_v8, %v1126_v46  ;;  %2982 = vmatprep.mubr.msk.f32.mxu1 %vm679_vm1, %v1240_v49 }
 0x310   : > { %v1128_v5 = vpop.f32.mrf.mxu0 }
 0x311   : > { %v1241_v52 = vmax.f32 %v1127_v4, 0.0 }
 0x312   : > { %v1131_v6 = vpop.f32.mrf.mxu0 }
 0x313   : > { %v1132_v40 = vadd.f32 %v3829_v8, %v1131_v6  ;;  %2983 = vmatmul.mubr.msk.f32.gmra.mxu1 %vm679_vm1, %v1241_v52 }
 0x314   : > { %v1133_v3 = vpop.f32.mrf.mxu0 }
 0x315   : > { %v1242_v39 = vmax.f32 %v1132_v40, 0.0 }
 0x316   : > { %v1136_v2 = vpop.f32.mrf.mxu0 }
 0x317   : > { %v1137_v63 = vadd.f32 %v3829_v8, %v1136_v2  ;;  %2985 = vmatprep.mubr.msk.f32.mxu1 %vm679_vm1, %v1242_v39 }
 0x318   : > { %v1138_v0 = vpop.f32.mrf.mxu0 }
 0x319   : > { %v1243_v7 = vmax.f32 %v1137_v63, 0.0 }
 0x31a   : > { %v1141_v1 = vpop.f32.mrf.mxu0 }
 0x31b   : > { %v1142_v46 = vadd.f32 %v3829_v8, %v1141_v1  ;;  %2986 = vmatmul.mubr.msk.f32.gmra.mxu1 %vm679_vm1, %v1243_v7 }
 0x31c   : > { %v1143_v49 = vpop.f32.mrf.mxu0 }
 0x31d   : > { %v1244_v4 = vmax.f32 %v1142_v46, 0.0 }
 0x31e   : > { %v1146_v5 = vpop.f32.mrf.mxu0 }
 0x31f   : > { %v1147_v6 = vadd.f32 %v3829_v8, %v1146_v5  ;;  %2988 = vmatprep.mubr.msk.f32.mxu1 %vm679_vm1, %v1244_v4 }
 0x320   : > { %v1148_v52 = vpop.f32.mrf.mxu0 }
 0x321   : > { %v1245_v40 = vmax.f32 %v1147_v6, 0.0 }
 0x322   : > { %v1151_v3 = vpop.f32.mrf.mxu0 }
 0x323   : > { %v1152_v2 = vadd.f32 %v3829_v8, %v1151_v3  ;;  %2989 = vmatmul.mubr.msk.f32.gmra.mxu1 %vm679_vm1, %v1245_v40 }
 0x324   : > { %v1153_v39 = vpop.f32.mrf.mxu0 }
 0x325   : > { %v1246_v63 = vmax.f32 %v1152_v2, 0.0 }
 0x326   : > { %v1156_v0 = vpop.f32.mrf.mxu0 }
 0x327   : > { %v1157_v1 = vadd.f32 %v3829_v8, %v1156_v0  ;;  %2991 = vmatprep.mubr.msk.f32.mxu1 %vm679_vm1, %v1246_v63 }
 0x328   : > { %v1158_v7 = vpop.f32.mrf.mxu0 }
 0x329   : > { %v1247_v46 = vmax.f32 %v1157_v1, 0.0 }
 0x32a   : > { %v1161_v49 = vpop.f32.mrf.mxu0 }
 0x32b   : > { %v1162_v5 = vadd.f32 %v3829_v8, %v1161_v49  ;;  %2992 = vmatmul.mubr.msk.f32.gmra.mxu1 %vm679_vm1, %v1247_v46 }
 0x32c   : > { %v1163_v4 = vpop.f32.mrf.mxu0 }
 0x32d   : > { %v1248_v6 = vmax.f32 %v1162_v5, 0.0 }
 0x32e   : > { %v1166_v52 = vpop.f32.mrf.mxu0 }
 0x32f   : > { %v1167_v3 = vadd.f32 %v3829_v8, %v1166_v52  ;;  %2994 = vmatprep.mubr.msk.f32.mxu1 %vm679_vm1, %v1248_v6 }
 0x330   : > { %v1168_v40 = vpop.f32.mrf.mxu0 }
 0x331   : > { %v1249_v2 = vmax.f32 %v1167_v3, 0.0 }
 0x332   : > { %v1171_v39 = vpop.f32.mrf.mxu0 }
 0x333   : > { %v1172_v0 = vadd.f32 %v3829_v8, %v1171_v39  ;;  %2995 = vmatmul.mubr.msk.f32.gmra.mxu1 %vm679_vm1, %v1249_v2 }
 0x334   : > { %v1173_v63 = vpop.f32.mrf.mxu0 }
 0x335   : > { %v1250_v1 = vmax.f32 %v1172_v0, 0.0 }
 0x336   : > { %v1176_v7 = vpop.f32.mrf.mxu0 }
 0x337   : > { %v1177_v49 = vadd.f32 %v3829_v8, %v1176_v7  ;;  %2997 = vmatprep.mubr.msk.f32.mxu1 %vm679_vm1, %v1250_v1 }
 0x338   : > { %v1178_v46 = vpop.f32.mrf.mxu0 }
 0x339   : > { %v1251_v5 = vmax.f32 %v1177_v49, 0.0 }
 0x33a   : > { %v1181_v4 = vpop.f32.mrf.mxu0 }
 0x33b   : > { %v1182_v52 = vadd.f32 %v3829_v8, %v1181_v4  ;;  %2998 = vmatmul.mubr.msk.f32.gmra.mxu1 %vm679_vm1, %v1251_v5 }
 0x33c   : > { %v1183_v6 = vpop.f32.mrf.mxu0 }
 0x33d   : > { %v1252_v3 = vmax.f32 %v1182_v52, 0.0 }
 0x33e   : > { %v1186_v40 = vpop.f32.mrf.mxu0 }
 0x33f   : > { %v1187_v39 = vadd.f32 %v3829_v8, %v1186_v40  ;;  %3000 = vmatprep.mubr.msk.f32.mxu1 %vm679_vm1, %v1252_v3 }
 0x340   : > { %v1188_v2 = vpop.f32.mrf.mxu0 }
 0x341   : > { %v1253_v0 = vmax.f32 %v1187_v39, 0.0 }
 0x342   : > { %v1191_v63 = vpop.f32.mrf.mxu0 }
 0x343   : > { %v1192_v7 = vadd.f32 %v3829_v8, %v1191_v63  ;;  %3001 = vmatmul.mubr.msk.f32.gmra.mxu1 %vm679_vm1, %v1253_v0 }
 0x344   : > { %v1193_v1 = vpop.f32.mrf.mxu0 }
 0x345   : > { %v1254_v49 = vmax.f32 %v1192_v7, 0.0 }
 0x346   : > { %v1196_v46 = vpop.f32.mrf.mxu0 }
 0x347   : > { %v1197_v4 = vadd.f32 %v3829_v8, %v1196_v46  ;;  %3003 = vmatprep.mubr.msk.f32.mxu1 %vm679_vm1, %v1254_v49 }
 0x348   : > { %v1198_v5 = vpop.f32.mrf.mxu0 }
 0x349   : > { %v1255_v52 = vmax.f32 %v1197_v4, 0.0 }
 0x34a   : > { %v1201_v6 = vpop.f32.mrf.mxu0 }
 0x34b   : > { %v1202_v40 = vadd.f32 %v3829_v8, %v1201_v6  ;;  %3004 = vmatmul.mubr.msk.f32.gmra.mxu1 %vm679_vm1, %v1255_v52 }
 0x34c   : > { %v1203_v3 = vpop.f32.mrf.mxu0 }
 0x34d   : > { %v1256_v39 = vmax.f32 %v1202_v40, 0.0 }
 0x34e   : > { %v1206_v2 = vpop.f32.mrf.mxu0 }
 0x34f   : > { %v1207_v63 = vadd.f32 %v3829_v8, %v1206_v2  ;;  %3006 = vmatprep.mubr.msk.f32.mxu1 %vm679_vm1, %v1256_v39 }
 0x350   : > { %v1208_v0 = vpop.f32.mrf.mxu0 }
 0x351   : > { %v1257_v7 = vmax.f32 %v1207_v63, 0.0 }
 0x352   : > { %v1211_v1 = vpop.f32.mrf.mxu0 }
 0x353   : > { %v1212_v46 = vadd.f32 %v3829_v8, %v1211_v1  ;;  %3007 = vmatmul.mubr.msk.f32.gmra.mxu1 %vm679_vm1, %v1257_v7 }
 0x354   : > { %v1213_v49 = vpop.f32.mrf.mxu0 }
 0x355   : > { %v1258_v4 = vmax.f32 %v1212_v46, 0.0 }
 0x356   : > { %v1216_v5 = vpop.f32.mrf.mxu0 }
 0x357   : > { %v1217_v6 = vadd.f32 %v3829_v8, %v1216_v5  ;;  %3009 = vmatprep.mubr.msk.f32.mxu1 %vm679_vm1, %v1258_v4 }
 0x358   : > { %v1218_v52 = vpop.f32.mrf.mxu0 }
 0x359   : > { %v1259_v40 = vmax.f32 %v1217_v6, 0.0 }
 0x35a   : > { %v1221_v3 = vpop.f32.mrf.mxu0 }
 0x35b   : > { %v1222_v2 = vadd.f32 %v3829_v8, %v1221_v3  ;;  %3010 = vmatmul.mubr.msk.f32.gmra.mxu1 %vm679_vm1, %v1259_v40 }
 0x35c   : > { %v1223_v39 = vpop.f32.mrf.mxu0 }
 0x35d   : > { %v1260_v63 = vmax.f32 %v1222_v2, 0.0 }
 0x35e   : > { %v1226_v0 = vpop.f32.mrf.mxu0 }
 0x35f   : > { %v1227_v1 = vadd.f32 %v3829_v8, %v1226_v0  ;;  %3012 = vmatprep.mubr.msk.f32.mxu1 %vm679_vm1, %v1260_v63 }
 0x360   : > { %v1228_v7 = vpop.f32.mrf.mxu0 }
 0x361   : > { %v1261_v46 = vmax.f32 %v1227_v1, 0.0 }
 0x363   : > { %3013 = vmatmul.mubr.msk.f32.gmra.mxu1 %vm679_vm1, %v1261_v46  ;;  %v4303_v46 = vmov 0.0  }
 0x364   : > { %1651 = vmatprep.mubr.f32.mxu1 %v3521_v41 }
 0x3ab   : > { %v2969_v49 = vpop.f32.mrf.mxu1 }
 0x3ad   : > { %v1424_v4 = vpop.f32.mrf.mxu1 }
 0x3b3   : > { %v2972_v5 = vpop.f32.mrf.mxu1 }
 0x3b5   : > { %v1434_v6 = vpop.f32.mrf.mxu1 }
 0x3bb   : > { %v2975_v52 = vpop.f32.mrf.mxu1 }
 0x3bd   : > { %v1444_v3 = vpop.f32.mrf.mxu1 }
 0x3c3   : > { %v2978_v40 = vpop.f32.mrf.mxu1 }
 0x3c5   : > { %v1454_v39 = vpop.f32.mrf.mxu1 }
 0x3cb   : > { %v2981_v2 = vpop.f32.mrf.mxu1 }
 0x3cd   : > { %v1464_v62 = vpop.f32.mrf.mxu1 }
 0x3d3   : > { %v2984_v61 = vpop.f32.mrf.mxu1 }
 0x3d5   : > { %v1474_v8 = vpop.f32.mrf.mxu1 }
 0x3db   : > { %v2987_v0 = vpop.f32.mrf.mxu1 }
 0x3dd   : > { %v1484_v63 = vpop.f32.mrf.mxu1 }
 0x3e3   : > { %v2990_v7 = vpop.f32.mrf.mxu1 }
 0x3e4   : > { %1588 = vmatpush1.msra.mxu1 %v2990_v7 }
 0x3e5   : > { %v1494_v1 = vpop.f32.mrf.mxu1  ;;  %1589 = vmatprep.subr.mxu1 %v4303_v46 }
 0x3e6   : > { %1590 = vmatpush1.msra.mxu1 %v1494_v1 }
 0x3e7   : > { %1591 = vmatprep.subr.mxu1 %v4303_v46 }
 0x3e8   : > { %1592 = vmatpush1.msra.mxu1 %v2987_v0 }
 0x3e9   : > { %1593 = vmatprep.subr.mxu1 %v4303_v46 }
 0x3ea   : > { %1594 = vmatpush1.msra.mxu1 %v1484_v63 }
 0x3eb   : > { %1595 = vmatprep.subr.mxu1 %v4303_v46  ;;  %v2993_v41 = vpop.f32.mrf.mxu1 }
 0x3ec   : > { %1596 = vmatpush1.msra.mxu1 %v2984_v61 }
 0x3ed   : > { %1597 = vmatprep.subr.mxu1 %v4303_v46  ;;  %v1504_v61 = vpop.f32.mrf.mxu1 }
 0x3ee   : > { %1598 = vmatpush1.msra.mxu1 %v1474_v8 }
 0x3ef   : > { %1599 = vmatprep.subr.mxu1 %v4303_v46 }
 0x3f0   : > { %1600 = vmatpush1.msra.mxu1 %v2981_v2 }
 0x3f1   : > { %1601 = vmatprep.subr.mxu1 %v4303_v46 }
 0x3f2   : > { %1602 = vmatpush1.msra.mxu1 %v1464_v62 }
 0x3f3   : > { %1603 = vmatprep.subr.mxu1 %v4303_v46  ;;  %v2996_v62 = vpop.f32.mrf.mxu1 }
 0x3f4   : > { %1604 = vmatpush1.msra.mxu1 %v2978_v40 }
 0x3f5   : > { %1605 = vmatprep.subr.mxu1 %v4303_v46  ;;  %v1514_v40 = vpop.f32.mrf.mxu1 }
 0x3f6   : > { %1606 = vmatpush1.msra.mxu1 %v1454_v39 }
 0x3f7   : > { %1607 = vmatprep.subr.mxu1 %v4303_v46 }
 0x3f8   : > { %1608 = vmatpush1.msra.mxu1 %v2975_v52 }
 0x3f9   : > { %1609 = vmatprep.subr.mxu1 %v4303_v46 }
 0x3fa   : > { %1610 = vmatpush1.msra.mxu1 %v1444_v3 }
 0x3fb   : > { %1611 = vmatprep.subr.mxu1 %v4303_v46  ;;  %v2999_v52 = vpop.f32.mrf.mxu1 }
 0x3fc   : > { %1612 = vmatpush1.msra.mxu1 %v2972_v5 }
 0x3fd   : > { %1613 = vmatprep.subr.mxu1 %v4303_v46  ;;  %v1524_v39 = vpop.f32.mrf.mxu1 }
 0x3fe   : > { %1614 = vmatpush1.msra.mxu1 %v1434_v6 }
 0x3ff   : > { %1615 = vmatprep.subr.mxu1 %v4303_v46 }
 0x400   : > { %1616 = vmatpush1.msra.mxu1 %v2969_v49 }
 0x401   : > { %1617 = vmatprep.subr.mxu1 %v4303_v46 }
 0x402   : > { %1618 = vmatpush1.msra.mxu1 %v1424_v4 }
 0x403   : > { %1619 = vmatprep.subr.mxu1 %v4303_v46  ;;  %v3002_v3 = vpop.f32.mrf.mxu1 }
 0x405   : > { %v1534_v2 = vpop.f32.mrf.mxu1 }
 0x40b   : > { %v3005_v8 = vpop.f32.mrf.mxu1 }
 0x40d   : > { %v1544_v5 = vpop.f32.mrf.mxu1 }
 0x413   : > { %v3008_v0 = vpop.f32.mrf.mxu1 }
 0x415   : > { %v1554_v63 = vpop.f32.mrf.mxu1 }
 0x41b   : > { %v3011_v7 = vpop.f32.mrf.mxu1 }
 0x41d   : > { %v1564_v6 = vpop.f32.mrf.mxu1 }
 0x423   : > { %v3014_v1 = vpop.f32.mrf.mxu1 }
 0x424   : > { %1620 = vmatpush2.msra.mxu1 %v3014_v1 }
 0x425   : > { %v1574_v60 = vpop.f32.mrf.mxu1  ;;  %1621 = vmatprep.subr.mxu1 %v4303_v46 }
 0x426   : > { %1622 = vmatpush2.msra.mxu1 %v1574_v60  ;;  %v250_v60 = vld [vmem:[%s4254_s2 + $0x68] sm:$0xff] }
 0x427   : > { %1623 = vmatprep.subr.mxu1 %v4303_v46  ;;  %3015 = vmatprep.subr.mxu0 %v250_v60 }
 0x428   : > { %1624 = vmatpush2.msra.mxu1 %v3011_v7  ;;  %3016 = vmatpush3.msra.mxu0 %v250_v60 }
 0x429   : > { %1625 = vmatprep.subr.mxu1 %v4303_v46 }
 0x42a   : > { %1626 = vmatpush2.msra.mxu1 %v1564_v6 }
 0x42b   : > { %1627 = vmatprep.subr.mxu1 %v4303_v46 }
 0x42c   : > { %1628 = vmatpush2.msra.mxu1 %v3008_v0 }
 0x42d   : > { %1629 = vmatprep.subr.mxu1 %v4303_v46 }
 0x42e   : > { %1630 = vmatpush2.msra.mxu1 %v1554_v63 }
 0x42f   : > { %1631 = vmatprep.subr.mxu1 %v4303_v46 }
 0x430   : > { %1632 = vmatpush2.msra.mxu1 %v3005_v8 }
 0x431   : > { %1633 = vmatprep.subr.mxu1 %v4303_v46 }
 0x432   : > { %1634 = vmatpush2.msra.mxu1 %v1544_v5 }
 0x433   : > { %1635 = vmatprep.subr.mxu1 %v4303_v46 }
 0x434   : > { %1636 = vmatpush2.msra.mxu1 %v3002_v3 }
 0x435   : > { %1637 = vmatprep.subr.mxu1 %v4303_v46 }
 0x436   : > { %1638 = vmatpush2.msra.mxu1 %v1534_v2 }
 0x437   : > { %1639 = vmatprep.subr.mxu1 %v4303_v46 }
 0x438   : > { %1640 = vmatpush2.msra.mxu1 %v2999_v52 }
 0x439   : > { %1641 = vmatprep.subr.mxu1 %v4303_v46 }
 0x43a   : > { %1642 = vmatpush2.msra.mxu1 %v1524_v39 }
 0x43b   : > { %1643 = vmatprep.subr.mxu1 %v4303_v46 }
 0x43c   : > { %1644 = vmatpush2.msra.mxu1 %v2996_v62 }
 0x43d   : > { %1645 = vmatprep.subr.mxu1 %v4303_v46 }
 0x43e   : > { %1646 = vmatpush2.msra.mxu1 %v1514_v40 }
 0x43f   : > { %1647 = vmatprep.subr.mxu1 %v4303_v46 }
 0x440   : > { %1648 = vmatpush2.msra.mxu1 %v2993_v41 }
 0x441   : > { %1649 = vmatprep.subr.mxu1 %v4303_v46 }
 0x442   : > { %1650 = vmatpush2.msra.mxu1 %v1504_v61 }
 0x443   : > { %1652 = vmatmul.mubr.f32.vlgmr.msra.gmra.mxu1 %v3560_v9  ;;  %v249_v9 = vld [vmem:[%s4254_s2 + $0x60] sm:$0xff] }
 0x444   : > { %1656 = vmatprep.mubr.f32.mxu1 %v3564_v10  ;;  %3017 = vmatprep.subr.mxu0 %v249_v9  ;;  %v248_v10 = vld [vmem:[%s4254_s2 + $0x58] sm:$0xff] }
 0x445   : > { %3018 = vmatpush3.msra.mxu0 %v249_v9 }
 0x446   : > { %3019 = vmatprep.subr.mxu0 %v248_v10 }
 0x447   : > { %1657 = vmatmul.mubr.f32.gmra.mxu1 %v3570_v11  ;;  %3020 = vmatpush3.msra.mxu0 %v248_v10  ;;  %v247_v11 = vld [vmem:[%s4254_s2 + $0x50] sm:$0xff] }
 0x448   : > { %1661 = vmatprep.mubr.f32.mxu1 %v3573_v12  ;;  %3021 = vmatprep.subr.mxu0 %v247_v11  ;;  %v4304_v12 = vld [vmem:[#allocation8_spill] sm:$0xff] }
 0x449   : > { %3022 = vmatpush3.msra.mxu0 %v247_v11 }
 0x44a   : > { %3071 = vmatprep.subr.mxu0 %v4303_v46 }
 0x44b   : > { %1662 = vmatmul.mubr.f32.gmra.mxu1 %v3578_v13  ;;  %v4305_v13 = vld [vmem:[#allocation9_spill] sm:$0xff] }
 0x44c   : > { %1666 = vmatprep.mubr.f32.mxu1 %v3581_v14  ;;  %v4306_v14 = vld [vmem:[#allocation10_spill] sm:$0xff] }
 0x44f   : > { %1667 = vmatmul.mubr.f32.gmra.mxu1 %v3586_v15  ;;  %v4307_v15 = vld [vmem:[#allocation11_spill] sm:$0xff] }
 0x450   : > { %1671 = vmatprep.mubr.f32.mxu1 %v3589_v16  ;;  %v4308_v16 = vld [vmem:[#allocation12_spill] sm:$0xff] }
 0x453   : > { %1672 = vmatmul.mubr.f32.gmra.mxu1 %v3594_v17  ;;  %v4309_v17 = vld [vmem:[#allocation13_spill] sm:$0xff] }
 0x454   : > { %1676 = vmatprep.mubr.f32.mxu1 %v3597_v18  ;;  %v4310_v18 = vld [vmem:[#allocation14_spill] sm:$0xff] }
 0x457   : > { %1677 = vmatmul.mubr.f32.gmra.mxu1 %v3602_v19  ;;  %v4311_v19 = vld [vmem:[#allocation15_spill] sm:$0xff] }
 0x458   : > { %1681 = vmatprep.mubr.f32.mxu1 %v3605_v20  ;;  %v4312_v20 = vld [vmem:[#allocation16_spill] sm:$0xff] }
 0x45b   : > { %1682 = vmatmul.mubr.f32.gmra.mxu1 %v3610_v21  ;;  %v4313_v21 = vld [vmem:[#allocation17_spill] sm:$0xff] }
 0x45c   : > { %1686 = vmatprep.mubr.f32.mxu1 %v3613_v22  ;;  %v4314_v22 = vld [vmem:[#allocation18_spill] sm:$0xff] }
 0x45f   : > { %1687 = vmatmul.mubr.f32.gmra.mxu1 %v3618_v23  ;;  %v4315_v23 = vld [vmem:[#allocation19_spill] sm:$0xff] }
 0x460   : > { %1691 = vmatprep.mubr.f32.mxu1 %v3621_v24  ;;  %v4316_v24 = vld [vmem:[#allocation20_spill] sm:$0xff] }
 0x463   : > { %1692 = vmatmul.mubr.f32.gmra.mxu1 %v3626_v25  ;;  %v4317_v25 = vld [vmem:[#allocation21_spill] sm:$0xff] }
 0x464   : > { %1696 = vmatprep.mubr.f32.mxu1 %v3629_v26  ;;  %v4318_v26 = vld [vmem:[#allocation22_spill] sm:$0xff] }
 0x467   : > { %1697 = vmatmul.mubr.f32.gmra.mxu1 %v3634_v27  ;;  %v4319_v27 = vld [vmem:[#allocation23_spill] sm:$0xff] }
 0x468   : > { %1701 = vmatprep.mubr.f32.mxu1 %v3637_v28  ;;  %v4320_v28 = vld [vmem:[#allocation24_spill] sm:$0xff] }
 0x46b   : > { %1702 = vmatmul.mubr.f32.gmra.mxu1 %v3642_v29  ;;  %v4321_v29 = vld [vmem:[#allocation25_spill] sm:$0xff] }
 0x46c   : > { %1706 = vmatprep.mubr.f32.mxu1 %v3645_v30  ;;  %v4006_v30 = vld [vmem:[%s4255_s3 + $0x2] ss:$0 sm:$0xff] }
 0x46f   : > { %1707 = vmatmul.mubr.f32.gmra.mxu1 %v3650_v31 }
 0x470   : > { %1711 = vmatprep.mubr.f32.mxu1 %v3653_v32 }
 0x473   : > { %1712 = vmatmul.mubr.f32.gmra.mxu1 %v3658_v33 }
 0x474   : > { %1716 = vmatprep.mubr.f32.mxu1 %v3661_v34 }
 0x477   : > { %1717 = vmatmul.mubr.f32.gmra.mxu1 %v3666_v35 }
 0x478   : > { %1721 = vmatprep.mubr.f32.mxu1 %v3669_v36 }
 0x47b   : > { %1722 = vmatmul.mubr.f32.gmra.mxu1 %v3674_v37 }
 0x47c   : > { %1726 = vmatprep.mubr.f32.mxu1 %v3677_v38 }
 0x47f   : > { %1727 = vmatmul.mubr.f32.gmra.mxu1 %v3682_v42 }
 0x480   : > { %1731 = vmatprep.mubr.f32.mxu1 %v3685_v43 }
 0x483   : > { %1732 = vmatmul.mubr.f32.gmra.mxu1 %v3690_v44 }
 0x484   : > { %1736 = vmatprep.mubr.f32.mxu1 %v3693_v45 }
 0x487   : > { %1737 = vmatmul.mubr.f32.gmra.mxu1 %v3701_v47 }
 0x488   : > { %1741 = vmatprep.mubr.f32.mxu1 %v3704_v48 }
 0x48b   : > { %1742 = vmatmul.mubr.f32.gmra.mxu1 %v3715_v50 }
 0x48c   : > { %1746 = vmatprep.mubr.f32.mxu1 %v3718_v51 }
 0x48f   : > { %1747 = vmatmul.mubr.f32.gmra.mxu1 %v3726_v53 }
 0x490   : > { %1751 = vmatprep.mubr.f32.mxu1 %v3730_v54 }
 0x493   : > { %1752 = vmatmul.mubr.f32.gmra.mxu1 %v3735_v55 }
 0x494   : > { %1756 = vmatprep.mubr.f32.mxu1 %v3738_v56 }
 0x497   : > { %1757 = vmatmul.mubr.f32.gmra.mxu1 %v3743_v57 }
 0x498   : > { %1761 = vmatprep.mubr.f32.mxu1 %v3746_v58 }
 0x49b   : > { %1762 = vmatmul.mubr.f32.gmra.mxu1 %v3751_v59 }
 0x49c   : > { %1766 = vmatprep.mubr.f32.mxu1 %v4304_v12 }
 0x49f   : > { %1767 = vmatmul.mubr.f32.gmra.mxu1 %v4305_v13 }
 0x4a0   : > { %1771 = vmatprep.mubr.f32.mxu1 %v4306_v14 }
 0x4a3   : > { %1772 = vmatmul.mubr.f32.gmra.mxu1 %v4307_v15 }
 0x4a4   : > { %1776 = vmatprep.mubr.f32.mxu1 %v4308_v16 }
 0x4a7   : > { %1777 = vmatmul.mubr.f32.gmra.mxu1 %v4309_v17 }
 0x4a8   : > { %1781 = vmatprep.mubr.f32.mxu1 %v4310_v18 }
 0x4ab   : > { %1782 = vmatmul.mubr.f32.gmra.mxu1 %v4311_v19 }
 0x4ac   : > { %1786 = vmatprep.mubr.f32.mxu1 %v4312_v20 }
 0x4af   : > { %1787 = vmatmul.mubr.f32.gmra.mxu1 %v4313_v21 }
 0x4b0   : > { %1791 = vmatprep.mubr.f32.mxu1 %v4314_v22 }
 0x4b3   : > { %1792 = vmatmul.mubr.f32.gmra.mxu1 %v4315_v23 }
 0x4b4   : > { %1796 = vmatprep.mubr.f32.mxu1 %v4316_v24 }
 0x4b7   : > { %1797 = vmatmul.mubr.f32.gmra.mxu1 %v4317_v25 }
 0x4b8   : > { %1801 = vmatprep.mubr.f32.mxu1 %v4318_v26 }
 0x4bb   : > { %1802 = vmatmul.mubr.f32.gmra.mxu1 %v4319_v27 }
 0x4bc   : > { %1806 = vmatprep.mubr.f32.mxu1 %v4320_v28 }
 0x4bf   : > { %1807 = vmatmul.mubr.f32.gmra.mxu1 %v4321_v29 }
 0x503   : > { %v1653_v31 = vpop.f32.mrf.mxu1 }
 0x504   : > { %v1654_v32 = vadd.f32 %v4006_v30, %v1653_v31 }
 0x505   : > { %v1655_v33 = vpop.f32.mrf.mxu1 }
 0x506   : > { %v1812_v34 = vmax.f32 %v1654_v32, 0.0 }
 0x507   : > { %v1658_v35 = vpop.f32.mrf.mxu1 }
 0x508   : > { %v1659_v36 = vadd.f32 %v4006_v30, %v1658_v35  ;;  %3023 = vmatprep.mubr.msk.f32.mxu0 %vm679_vm1, %v1812_v34 }
 0x509   : > { %v1660_v37 = vpop.f32.mrf.mxu1 }
 0x50a   : > { %v1813_v38 = vmax.f32 %v1659_v36, 0.0 }
 0x50b   : > { %v1663_v42 = vpop.f32.mrf.mxu1 }
 0x50c   : > { %v1664_v43 = vadd.f32 %v4006_v30, %v1663_v42  ;;  %3024 = vmatmul.mubr.msk.f32.vlgmr.msra.gmra.mxu0 %vm679_vm1, %v1813_v38 }
 0x50d   : > { %v1665_v44 = vpop.f32.mrf.mxu1 }
 0x50e   : > { %v1814_v45 = vmax.f32 %v1664_v43, 0.0 }
 0x50f   : > { %v1668_v47 = vpop.f32.mrf.mxu1 }
 0x510   : > { %v1669_v48 = vadd.f32 %v4006_v30, %v1668_v47  ;;  %3026 = vmatprep.mubr.msk.f32.mxu0 %vm679_vm1, %v1814_v45 }
 0x511   : > { %v1670_v50 = vpop.f32.mrf.mxu1 }
 0x512   : > { %v1815_v51 = vmax.f32 %v1669_v48, 0.0 }
 0x513   : > { %v1673_v53 = vpop.f32.mrf.mxu1 }
 0x514   : > { %v1674_v54 = vadd.f32 %v4006_v30, %v1673_v53  ;;  %3027 = vmatmul.mubr.msk.f32.gmra.mxu0 %vm679_vm1, %v1815_v51 }
 0x515   : > { %v1675_v55 = vpop.f32.mrf.mxu1 }
 0x516   : > { %v1816_v56 = vmax.f32 %v1674_v54, 0.0 }
 0x517   : > { %v1678_v57 = vpop.f32.mrf.mxu1 }
 0x518   : > { %v1679_v58 = vadd.f32 %v4006_v30, %v1678_v57  ;;  %3029 = vmatprep.mubr.msk.f32.mxu0 %vm679_vm1, %v1816_v56 }
 0x519   : > { %v1680_v59 = vpop.f32.mrf.mxu1 }
 0x51a   : > { %v1817_v49 = vmax.f32 %v1679_v58, 0.0 }
 0x51b   : > { %v1683_v4 = vpop.f32.mrf.mxu1 }
 0x51c   : > { %v1684_v41 = vadd.f32 %v4006_v30, %v1683_v4  ;;  %3030 = vmatmul.mubr.msk.f32.gmra.mxu0 %vm679_vm1, %v1817_v49 }
 0x51d   : > { %v1685_v61 = vpop.f32.mrf.mxu1 }
 0x51e   : > { %v1818_v62 = vmax.f32 %v1684_v41, 0.0 }
 0x51f   : > { %v1688_v40 = vpop.f32.mrf.mxu1 }
 0x520   : > { %v1689_v52 = vadd.f32 %v4006_v30, %v1688_v40  ;;  %3032 = vmatprep.mubr.msk.f32.mxu0 %vm679_vm1, %v1818_v62 }
 0x521   : > { %v1690_v39 = vpop.f32.mrf.mxu1 }
 0x522   : > { %v1819_v3 = vmax.f32 %v1689_v52, 0.0 }
 0x523   : > { %v1693_v2 = vpop.f32.mrf.mxu1 }
 0x524   : > { %v1694_v8 = vadd.f32 %v4006_v30, %v1693_v2  ;;  %3033 = vmatmul.mubr.msk.f32.gmra.mxu0 %vm679_vm1, %v1819_v3 }
 0x525   : > { %v1695_v5 = vpop.f32.mrf.mxu1 }
 0x526   : > { %v1820_v0 = vmax.f32 %v1694_v8, 0.0 }
 0x527   : > { %v1698_v63 = vpop.f32.mrf.mxu1 }
 0x528   : > { %v1699_v7 = vadd.f32 %v4006_v30, %v1698_v63  ;;  %3035 = vmatprep.mubr.msk.f32.mxu0 %vm679_vm1, %v1820_v0 }
 0x529   : > { %v1700_v6 = vpop.f32.mrf.mxu1 }
 0x52a   : > { %v1821_v1 = vmax.f32 %v1699_v7, 0.0 }
 0x52b   : > { %v1703_v60 = vpop.f32.mrf.mxu1 }
 0x52c   : > { %v1704_v9 = vadd.f32 %v4006_v30, %v1703_v60  ;;  %3036 = vmatmul.mubr.msk.f32.gmra.mxu0 %vm679_vm1, %v1821_v1 }
 0x52d   : > { %v1705_v10 = vpop.f32.mrf.mxu1 }
 0x52e   : > { %v1822_v11 = vmax.f32 %v1704_v9, 0.0 }
 0x52f   : > { %v1708_v12 = vpop.f32.mrf.mxu1 }
 0x530   : > { %v1709_v13 = vadd.f32 %v4006_v30, %v1708_v12  ;;  %3038 = vmatprep.mubr.msk.f32.mxu0 %vm679_vm1, %v1822_v11 }
 0x531   : > { %v1710_v14 = vpop.f32.mrf.mxu1 }
 0x532   : > { %v1823_v15 = vmax.f32 %v1709_v13, 0.0 }
 0x533   : > { %v1713_v16 = vpop.f32.mrf.mxu1 }
 0x534   : > { %v1714_v17 = vadd.f32 %v4006_v30, %v1713_v16  ;;  %3039 = vmatmul.mubr.msk.f32.gmra.mxu0 %vm679_vm1, %v1823_v15 }
 0x535   : > { %v1715_v18 = vpop.f32.mrf.mxu1 }
 0x536   : > { %v1824_v19 = vmax.f32 %v1714_v17, 0.0 }
 0x537   : > { %v1718_v20 = vpop.f32.mrf.mxu1 }
 0x538   : > { %v1719_v21 = vadd.f32 %v4006_v30, %v1718_v20  ;;  %3041 = vmatprep.mubr.msk.f32.mxu0 %vm679_vm1, %v1824_v19 }
 0x539   : > { %v1720_v22 = vpop.f32.mrf.mxu1 }
 0x53a   : > { %v1825_v23 = vmax.f32 %v1719_v21, 0.0 }
 0x53b   : > { %v1723_v24 = vpop.f32.mrf.mxu1 }
 0x53c   : > { %v1724_v25 = vadd.f32 %v4006_v30, %v1723_v24  ;;  %3042 = vmatmul.mubr.msk.f32.gmra.mxu0 %vm679_vm1, %v1825_v23 }
 0x53d   : > { %v1725_v26 = vpop.f32.mrf.mxu1 }
 0x53e   : > { %v1826_v27 = vmax.f32 %v1724_v25, 0.0 }
 0x53f   : > { %v1728_v28 = vpop.f32.mrf.mxu1 }
 0x540   : > { %v1729_v29 = vadd.f32 %v4006_v30, %v1728_v28  ;;  %3044 = vmatprep.mubr.msk.f32.mxu0 %vm679_vm1, %v1826_v27 }
 0x541   : > { %v1730_v31 = vpop.f32.mrf.mxu1 }
 0x542   : > { %v1827_v32 = vmax.f32 %v1729_v29, 0.0 }
 0x543   : > { %v1733_v33 = vpop.f32.mrf.mxu1 }
 0x544   : > { %v1734_v34 = vadd.f32 %v4006_v30, %v1733_v33  ;;  %3045 = vmatmul.mubr.msk.f32.gmra.mxu0 %vm679_vm1, %v1827_v32 }
 0x545   : > { %v1735_v35 = vpop.f32.mrf.mxu1 }
 0x546   : > { %v1828_v36 = vmax.f32 %v1734_v34, 0.0  ;;  %v256_v35 = vld [vmem:[%s4255_s3 + $0x4] sm:$0x1] }
 0x547   : > { %v1738_v37 = vpop.f32.mrf.mxu1 }
 0x548   : > { %v1739_v38 = vadd.f32 %v4006_v30, %v1738_v37  ;;  %3047 = vmatprep.mubr.msk.f32.mxu0 %vm679_vm1, %v1828_v36  ;;  %v3229_v36 = vmov 0  }
 0x549   : > { %v1740_v42 = vpop.f32.mrf.mxu1  ;;  %3129 = vset.pattern.permute.xlu0 %v3229_v36 }
 0x54a   : > { %v1829_v43 = vmax.f32 %v1739_v38, 0.0  ;;  %2347 = vperm.xlu0 %3129, %v256_v35  }
 0x54b   : > { %v1743_v44 = vpop.f32.mrf.mxu1 }
 0x54c   : > { %v1744_v45 = vadd.f32 %v4006_v30, %v1743_v44  ;;  %3048 = vmatmul.mubr.msk.f32.gmra.mxu0 %vm679_vm1, %v1829_v43 }
 0x54d   : > { %v1745_v47 = vpop.f32.mrf.mxu1 }
 0x54e   : > { %v1830_v48 = vmax.f32 %v1744_v45, 0.0 }
 0x54f   : > { %v1748_v50 = vpop.f32.mrf.mxu1 }
 0x550   : > { %v1749_v51 = vadd.f32 %v4006_v30, %v1748_v50  ;;  %3050 = vmatprep.mubr.msk.f32.mxu0 %vm679_vm1, %v1830_v48 }
 0x551   : > { %v1750_v53 = vpop.f32.mrf.mxu1 }
 0x552   : > { %v1831_v54 = vmax.f32 %v1749_v51, 0.0 }
 0x553   : > { %v1753_v55 = vpop.f32.mrf.mxu1 }
 0x554   : > { %v1754_v56 = vadd.f32 %v4006_v30, %v1753_v55  ;;  %3051 = vmatmul.mubr.msk.f32.gmra.mxu0 %vm679_vm1, %v1831_v54 }
 0x555   : > { %v1755_v57 = vpop.f32.mrf.mxu1 }
 0x556   : > { %v1832_v58 = vmax.f32 %v1754_v56, 0.0  ;;  %v4087_v56 = vld [vmem:[%s4255_s3 + $0x3] ss:$0 sm:$0xff] }
 0x557   : > { %v1758_v59 = vpop.f32.mrf.mxu1 }
 0x558   : > { %v1759_v49 = vadd.f32 %v4006_v30, %v1758_v59  ;;  %3053 = vmatprep.mubr.msk.f32.mxu0 %vm679_vm1, %v1832_v58 }
 0x559   : > { %v1760_v4 = vpop.f32.mrf.mxu1 }
 0x55a   : > { %v1833_v41 = vmax.f32 %v1759_v49, 0.0 }
 0x55b   : > { %v1763_v61 = vpop.f32.mrf.mxu1 }
 0x55c   : > { %v1764_v62 = vadd.f32 %v4006_v30, %v1763_v61  ;;  %3054 = vmatmul.mubr.msk.f32.gmra.mxu0 %vm679_vm1, %v1833_v41 }
 0x55d   : > { %v1765_v40 = vpop.f32.mrf.mxu1 }
 0x55e   : > { %v1834_v52 = vmax.f32 %v1764_v62, 0.0 }
 0x55f   : > { %v1768_v39 = vpop.f32.mrf.mxu1 }
 0x560   : > { %v1769_v3 = vadd.f32 %v4006_v30, %v1768_v39  ;;  %3056 = vmatprep.mubr.msk.f32.mxu0 %vm679_vm1, %v1834_v52 }
 0x561   : > { %v1770_v2 = vpop.f32.mrf.mxu1 }
 0x562   : > { %v1835_v8 = vmax.f32 %v1769_v3, 0.0 }
 0x563   : > { %v1773_v5 = vpop.f32.mrf.mxu1 }
 0x564   : > { %v1774_v0 = vadd.f32 %v4006_v30, %v1773_v5  ;;  %3057 = vmatmul.mubr.msk.f32.gmra.mxu0 %vm679_vm1, %v1835_v8 }
 0x565   : > { %v1775_v63 = vpop.f32.mrf.mxu1 }
 0x566   : > { %v1836_v7 = vmax.f32 %v1774_v0, 0.0 }
 0x567   : > { %v1778_v6 = vpop.f32.mrf.mxu1 }
 0x568   : > { %v1779_v1 = vadd.f32 %v4006_v30, %v1778_v6  ;;  %3059 = vmatprep.mubr.msk.f32.mxu0 %vm679_vm1, %v1836_v7 }
 0x569   : > { %v1780_v60 = vpop.f32.mrf.mxu1 }
 0x56a   : > { %v1837_v9 = vmax.f32 %v1779_v1, 0.0 }
 0x56b   : > { %v1783_v10 = vpop.f32.mrf.mxu1 }
 0x56c   : > { %v1784_v11 = vadd.f32 %v4006_v30, %v1783_v10  ;;  %3060 = vmatmul.mubr.msk.f32.gmra.mxu0 %vm679_vm1, %v1837_v9 }
 0x56d   : > { %v1785_v12 = vpop.f32.mrf.mxu1 }
 0x56e   : > { %v1838_v13 = vmax.f32 %v1784_v11, 0.0 }
 0x56f   : > { %v1788_v14 = vpop.f32.mrf.mxu1 }
 0x570   : > { %v1789_v15 = vadd.f32 %v4006_v30, %v1788_v14  ;;  %3062 = vmatprep.mubr.msk.f32.mxu0 %vm679_vm1, %v1838_v13 }
 0x571   : > { %v1790_v16 = vpop.f32.mrf.mxu1 }
 0x572   : > { %v1839_v17 = vmax.f32 %v1789_v15, 0.0 }
 0x573   : > { %v1793_v18 = vpop.f32.mrf.mxu1 }
 0x574   : > { %v1794_v19 = vadd.f32 %v4006_v30, %v1793_v18  ;;  %3063 = vmatmul.mubr.msk.f32.gmra.mxu0 %vm679_vm1, %v1839_v17 }
 0x575   : > { %v1795_v20 = vpop.f32.mrf.mxu1 }
 0x576   : > { %v1840_v21 = vmax.f32 %v1794_v19, 0.0 }
 0x577   : > { %v1798_v22 = vpop.f32.mrf.mxu1 }
 0x578   : > { %v1799_v23 = vadd.f32 %v4006_v30, %v1798_v22  ;;  %3065 = vmatprep.mubr.msk.f32.mxu0 %vm679_vm1, %v1840_v21 }
 0x579   : > { %v1800_v24 = vpop.f32.mrf.mxu1 }
 0x57a   : > { %v1841_v25 = vmax.f32 %v1799_v23, 0.0 }
 0x57b   : > { %v1803_v26 = vpop.f32.mrf.mxu1 }
 0x57c   : > { %v1804_v27 = vadd.f32 %v4006_v30, %v1803_v26  ;;  %3066 = vmatmul.mubr.msk.f32.gmra.mxu0 %vm679_vm1, %v1841_v25 }
 0x57d   : > { %v1805_v28 = vpop.f32.mrf.mxu1 }
 0x57e   : > { %v1842_v29 = vmax.f32 %v1804_v27, 0.0 }
 0x57f   : > { %v1808_v31 = vpop.f32.mrf.mxu1 }
 0x580   : > { %v1809_v32 = vadd.f32 %v4006_v30, %v1808_v31  ;;  %3068 = vmatprep.mubr.msk.f32.mxu0 %vm679_vm1, %v1842_v29 }
 0x581   : > { %v1810_v33 = vpop.f32.mrf.mxu1 }
 0x582   : > { %v1843_v34 = vmax.f32 %v1809_v32, 0.0 }
 0x584   : > { %3069 = vmatmul.mubr.msk.f32.gmra.mxu0 %vm679_vm1, %v1843_v34 }
 0x585   : > { %3075 = vmatprep.mubr.msk.f32.mxu0 %vm3228_vm2, %v4303_v46 }
 0x5cc   : > { %v3025_v37 = vpop.f32.mrf.mxu0 }
 0x5cd   : > { %v2016_v59 = vadd.f32 %v3025_v37, %v4087_v56 }
 0x5ce   : > { %v2010_v38 = vpop.f32.mrf.mxu0 }
 0x5cf   : > { %v2011_v57 = vadd.f32 %v4087_v56, %v2010_v38  ;;  %v2170_v61 = vmax.f32 %v2016_v59, 0.0 }
 0x5d1   : > { %v2169_v49 = vmax.f32 %v2011_v57, 0.0  ;;  %v2202_v3 = vsel %vm679_vm1, %v2170_v61, 0.0 }
 0x5d3   : > { %v2201_v52 = vsel %vm679_vm1, %v2169_v49, 0.0 }
 0x5d4   : > { %v3028_v42 = vpop.f32.mrf.mxu0  ;;  %v2203_v8 = vadd.f32 %v2202_v3, %v2201_v52 }
 0x5d5   : > { %v2026_v40 = vadd.f32 %v3028_v42, %v4087_v56 }
 0x5d6   : > { %v2020_v30 = vpop.f32.mrf.mxu0  ;;  %v2204_v1 = vrot.slane %v2203_v8, 4 }
 0x5d7   : > { %v2021_v41 = vadd.f32 %v4087_v56, %v2020_v30  ;;  %v2172_v5 = vmax.f32 %v2026_v40, 0.0 }
 0x5d8   : > { %v2205_v14 = vadd.f32 %v2204_v1, %v2203_v8 }
 0x5d9   : > { %v2171_v39 = vmax.f32 %v2021_v41, 0.0  ;;  %v2211_v60 = vsel %vm679_vm1, %v2172_v5, 0.0 }
 0x5da   : > { %v2206_v22 = vrot.slane %v2205_v14, 2 }
 0x5db   : > { %v2210_v7 = vsel %vm679_vm1, %v2171_v39, 0.0 }
 0x5dc   : > { %v3031_v43 = vpop.f32.mrf.mxu0  ;;  %v2212_v10 = vadd.f32 %v2211_v60, %v2210_v7  ;;  %v4107_v28 = vadd.f32 %v2206_v22, %v2205_v14 }
 0x5dd   : > { %v2036_v6 = vadd.f32 %v3031_v43, %v4087_v56 }
 0x5de   : > { %v2030_v44 = vpop.f32.mrf.mxu0  ;;  %v2213_v17 = vrot.slane %v2212_v10, 4  ;;  %v2208_v42 = vrot.slane %v4107_v28, 1 }
 0x5df   : > { %v2031_v0 = vadd.f32 %v4087_v56, %v2030_v44  ;;  %v2174_v12 = vmax.f32 %v2036_v6, 0.0 }
 0x5e0   : > { %v2214_v24 = vadd.f32 %v2213_v17, %v2212_v10 }
 0x5e1   : > { %v2173_v9 = vmax.f32 %v2031_v0, 0.0  ;;  %v2220_v18 = vsel %vm679_vm1, %v2174_v12, 0.0 }
 0x5e2   : > { %v2215_v32 = vrot.slane %v2214_v24, 2 }
 0x5e3   : > { %v2219_v15 = vsel %vm679_vm1, %v2173_v9, 0.0 }
 0x5e4   : > { %v3034_v45 = vpop.f32.mrf.mxu0  ;;  %v2221_v20 = vadd.f32 %v2220_v18, %v2219_v15  ;;  %v4119_v44 = vadd.f32 %v2215_v32, %v2214_v24 }
 0x5e5   : > { %v2046_v19 = vadd.f32 %v3034_v45, %v4087_v56 }
 0x5e6   : > { %v2040_v47 = vpop.f32.mrf.mxu0  ;;  %v2222_v27 = vrot.slane %v2221_v20, 4 }
 0x5e7   : > { %v2041_v16 = vadd.f32 %v4087_v56, %v2040_v47  ;;  %v2176_v26 = vmax.f32 %v2046_v19, 0.0 }
 0x5e8   : > { %v4113_v36 = vadd.f32 %v2222_v27, %v2221_v20 }
 0x5e9   : > { %v2175_v23 = vmax.f32 %v2041_v16, 0.0  ;;  %v2229_v35 = vsel %vm679_vm1, %v2176_v26, 0.0 }
 0x5ea   : > { %v2224_v61 = vrot.slane %v4113_v36, 2 }
 0x5eb   : > { %v2228_v29 = vsel %vm679_vm1, %v2175_v23, 0.0 }
 0x5ec   : > { %v3037_v48 = vpop.f32.mrf.mxu0  ;;  %v4115_v37 = vadd.f32 %v2229_v35, %v2228_v29 }
 0x5ed   : > { %v2056_v31 = vadd.f32 %v3037_v48, %v4087_v56 }
 0x5ee   : > { %v2050_v50 = vpop.f32.mrf.mxu0  ;;  %v2231_v40 = vrot.slane %v4115_v37, 4 }
 0x5ef   : > { %v2051_v33 = vadd.f32 %v4087_v56, %v2050_v50  ;;  %v2178_v30 = vmax.f32 %v2056_v31, 0.0 }
 0x5f1   : > { %v2177_v45 = vmax.f32 %v2051_v33, 0.0  ;;  %v2238_v3 = vsel %vm679_vm1, %v2178_v30, 0.0 }
 0x5f4   : > { %v4076_v51 = vpop.f32.mrf.mxu0 }
 0x5f5   : > { %v4125_v57 = vadd.f32 %v4076_v51, %v4087_v56 }
 0x5f6   : > { %v4078_v53 = vpop.f32.mrf.mxu0 }
 0x5f7   : > { %v2061_v59 = vadd.f32 %v4087_v56, %v4078_v53  ;;  %v2237_v53 = vsel %vm679_vm1, %v2177_v45, 0.0  ;;  %v2180_v7 = vmax.f32 %v4125_v57, 0.0 }
 0x5f9   : > { %v2179_v6 = vmax.f32 %v2061_v59, 0.0 }
 0x5fc   : > { %v4080_v54 = vpop.f32.mrf.mxu0 }
 0x5fd   : > { %v2076_v9 = vadd.f32 %v4080_v54, %v4087_v56 }
 0x5fe   : > { %v4082_v55 = vpop.f32.mrf.mxu0 }
 0x604   : > { %v4090_v58 = vpop.f32.mrf.mxu0 }
 0x605   : > { %v2086_v24 = vadd.f32 %v4090_v58, %v4087_v56 }
 0x606   : > { %v4093_v4 = vpop.f32.mrf.mxu0 }
 0x607   : > { %v2081_v17 = vadd.f32 %v4087_v56, %v4093_v4 }
 0x609   : > { %v2183_v30 = vmax.f32 %v2081_v17, 0.0 }
 0x60c   : > { %v3049_v62 = vpop.f32.mrf.mxu0 }
 0x60d   : > { %v2096_v51 = vadd.f32 %v3049_v62, %v4087_v56  ;;  %v2071_v62 = vadd.f32 %v4087_v56, %v4082_v55 }
 0x60e   : > { %v2090_v2 = vpop.f32.mrf.mxu0 }
 0x60f   : > { %v2091_v47 = vadd.f32 %v4087_v56, %v2090_v2  ;;  %v2181_v33 = vmax.f32 %v2071_v62, 0.0 }
 0x611   : > { %v2185_v5 = vmax.f32 %v2091_v47, 0.0  ;;  %v2239_v47 = vadd.f32 %v2238_v3, %v2237_v53 }
 0x613   : > { %v2273_v18 = vsel %vm679_vm1, %v2185_v5, 0.0  ;;  %v2240_v17 = vrot.slane %v2239_v47, 4 }
 0x614   : > { %v3052_v63 = vpop.f32.mrf.mxu0 }
 0x615   : > { %v2106_v49 = vadd.f32 %v3052_v63, %v4087_v56 }
 0x616   : > { %v2100_v11 = vpop.f32.mrf.mxu0 }
 0x617   : > { %v2101_v43 = vadd.f32 %v4087_v56, %v2100_v11  ;;  %v2188_v1 = vmax.f32 %v2106_v49, 0.0  ;;  %v2246_v49 = vsel %vm679_vm1, %v2179_v6, 0.0 }
 0x619   : > { %v2187_v2 = vmax.f32 %v2101_v43, 0.0  ;;  %v2283_v55 = vsel %vm679_vm1, %v2188_v1, 0.0 }
 0x61b   : > { %v2282_v14 = vsel %vm679_vm1, %v2187_v2, 0.0  ;;  %v2255_v2 = vsel %vm679_vm1, %v2181_v33, 0.0 }
 0x61c   : > { %v3055_v13 = vpop.f32.mrf.mxu0 }
 0x61d   : > { %v2116_v52 = vadd.f32 %v3055_v13, %v4087_v56  ;;  %v2186_v13 = vmax.f32 %v2096_v51, 0.0  ;;  %v2247_v51 = vsel %vm679_vm1, %v2180_v7, 0.0 }
 0x61e   : > { %v2110_v21 = vpop.f32.mrf.mxu0 }
 0x61f   : > { %v2111_v48 = vadd.f32 %v4087_v56, %v2110_v21  ;;  %v2190_v10 = vmax.f32 %v2116_v52, 0.0  ;;  %v2274_v27 = vsel %vm679_vm1, %v2186_v13, 0.0  ;;  %v4174_v13 = vadd.f32 %v2224_v61, %v4113_v36 }
 0x621   : > { %v2189_v0 = vmax.f32 %v2111_v48, 0.0  ;;  %v2292_v26 = vsel %vm679_vm1, %v2190_v10, 0.0  ;;  %v2182_v48 = vmax.f32 %v2076_v9, 0.0 }
 0x623   : > { %v2291_v19 = vsel %vm679_vm1, %v2189_v0, 0.0  ;;  %v2256_v6 = vsel %vm679_vm1, %v2182_v48, 0.0 }
 0x624   : > { %v3058_v25 = vpop.f32.mrf.mxu0  ;;  %v2293_v29 = vadd.f32 %v2292_v26, %v2291_v19  ;;  %v2257_v10 = vadd.f32 %v2256_v6, %v2255_v2 }
 0x625   : > { %v2126_v8 = vadd.f32 %v3058_v25, %v4087_v56  ;;  %v2284_v25 = vadd.f32 %v2283_v55, %v2282_v14 }
 0x626   : > { %v2120_v34 = vpop.f32.mrf.mxu0  ;;  %v2294_v52 = vrot.slane %v2293_v29, 4  ;;  %v2258_v36 = vrot.slane %v2257_v10, 4 }
 0x627   : > { %v2121_v41 = vadd.f32 %v4087_v56, %v2120_v34  ;;  %v2192_v15 = vmax.f32 %v2126_v8, 0.0  ;;  %v2275_v34 = vadd.f32 %v2274_v27, %v2273_v18 }
 0x628   : > { %v2295_v7 = vadd.f32 %v2294_v52, %v2293_v29 }
 0x629   : > { %v2191_v60 = vmax.f32 %v2121_v41, 0.0  ;;  %v2301_v31 = vsel %vm679_vm1, %v2192_v15, 0.0  ;;  %v2184_v41 = vmax.f32 %v2086_v24, 0.0  ;;  %v2276_v8 = vrot.slane %v2275_v34, 4 }
 0x62a   : > { %v2232_v24 = vadd.f32 %v2231_v40, %v4115_v37  ;;  %v2296_v61 = vrot.slane %v2295_v7, 2  ;;  %v2259_v37 = vadd.f32 %v2258_v36, %v2257_v10 }
 0x62b   : > { %v2300_v21 = vsel %vm679_vm1, %v2191_v60, 0.0  ;;  %v2248_v60 = vadd.f32 %v2247_v51, %v2246_v49  ;;  %v2277_v15 = vadd.f32 %v2276_v8, %v2275_v34 }
 0x62c   : > { %v3061_v38 = vpop.f32.mrf.mxu0  ;;  %v2302_v35 = vadd.f32 %v2301_v31, %v2300_v21  ;;  %v2297_v40 = vadd.f32 %v2296_v61, %v2295_v7 }
 0x62d   : > { %v2136_v63 = vadd.f32 %v3061_v38, %v4087_v56 }
 0x62e   : > { %v2130_v50 = vpop.f32.mrf.mxu0  ;;  %v2303_v5 = vrot.slane %v2302_v35, 4 }
 0x62f   : > { %v2131_v39 = vadd.f32 %v4087_v56, %v2130_v50  ;;  %v2194_v54 = vmax.f32 %v2136_v63, 0.0  ;;  %v2285_v50 = vrot.slane %v2284_v25, 4  ;;  %v2264_v63 = vsel %vm679_vm1, %v2183_v30, 0.0 }
 0x631   : > { %v2193_v11 = vmax.f32 %v2131_v39, 0.0  ;;  %v2310_v38 = vsel %vm679_vm1, %v2194_v54, 0.0  ;;  %v2286_v9 = vadd.f32 %v2285_v50, %v2284_v25 }
 0x633   : > { %v2309_v4 = vsel %vm679_vm1, %v2193_v11, 0.0  ;;  %v2265_v11 = vsel %vm679_vm1, %v2184_v41, 0.0  ;;  %v2287_v55 = vrot.slane %v2286_v9, 2 }
 0x634   : > { %v3064_v12 = vpop.f32.mrf.mxu0  ;;  %v2311_v43 = vadd.f32 %v2310_v38, %v2309_v4  ;;  %v2266_v14 = vadd.f32 %v2265_v11, %v2264_v63  ;;  %v2278_v4 = vrot.slane %v2277_v15, 2  ;;  %v2298_v63 = vrot.slane %v2297_v40, 1 }
 0x635   : > { %v2146_v16 = vadd.f32 %v3064_v12, %v4087_v56  ;;  %v2288_v30 = vadd.f32 %v2287_v55, %v2286_v9  ;;  %v2217_v9 = vrot.slane %v4119_v44, 1 }
 0x636   : > { %v2140_v20 = vpop.f32.mrf.mxu0  ;;  %v2312_v3 = vrot.slane %v2311_v43, 4  ;;  %v2267_v26 = vrot.slane %v2266_v14, 4 }
 0x637   : > { %v2196_v22 = vmax.f32 %v2146_v16, 0.0  ;;  %v2141_v23 = vadd.f32 %v4087_v56, %v2140_v20  ;;  %v2304_v16 = vadd.f32 %v2303_v5, %v2302_v35  ;;  %v2249_v20 = vrot.slane %v2248_v60, 4 }
 0x638   : > { %v2313_v18 = vadd.f32 %v2312_v3, %v2311_v43  ;;  %v2268_v50 = vadd.f32 %v2267_v26, %v2266_v14  ;;  %v2289_v51 = vrot.slane %v2288_v30, 1 }
 0x639   : > { %v2195_v32 = vmax.f32 %v2141_v23, 0.0  ;;  %v2319_v58 = vsel %vm679_vm1, %v2196_v22, 0.0  ;;  %v2305_v27 = vrot.slane %v2304_v16, 2  ;;  %v2250_v38 = vadd.f32 %v2249_v20, %v2248_v60 }
 0x63a   : > { %v2314_v33 = vrot.slane %v2313_v18, 2 }
 0x63b   : > { %v2318_v45 = vsel %vm679_vm1, %v2195_v32, 0.0  ;;  %v2241_v32 = vadd.f32 %v2240_v17, %v2239_v47 }
 0x63c   : > { %v2320_v57 = vadd.f32 %v2319_v58, %v2318_v45  ;;  %v3067_v59 = vpop.f32.mrf.mxu0  ;;  %v2233_v45 = vrot.slane %v2232_v24, 2  ;;  %v2315_v52 = vadd.f32 %v2314_v33, %v2313_v18  ;;  %v2299_v18 = vadd.f32 %v2298_v63, %v2297_v40 }
 0x63d   : > { %v2156_v39 = vadd.f32 %v3067_v59, %v4087_v56  ;;  %v2306_v59 = vadd.f32 %v2305_v27, %v2304_v16  ;;  %v2242_v41 = vrot.slane %v2241_v32, 2 }
 0x63e   : > { %v2150_v0 = vpop.f32.mrf.mxu0  ;;  %v2321_v62 = vrot.slane %v2320_v57, 4  ;;  %v2234_v5 = vadd.f32 %v2233_v45, %v2232_v24  ;;  %v2316_v11 = vrot.slane %v2315_v52, 1 }
 0x63f   : > { %v2198_v53 = vmax.f32 %v2156_v39, 0.0  ;;  %v2151_v1 = vadd.f32 %v4087_v56, %v2150_v0  ;;  %v2260_v0 = vrot.slane %v2259_v37, 2  ;;  %v2307_v60 = vrot.slane %v2306_v59, 1 }
 0x640   : > { %v2322_v21 = vadd.f32 %v2321_v62, %v2320_v57  ;;  %v2279_v57 = vadd.f32 %v2278_v4, %v2277_v15  ;;  %v2226_v62 = vrot.slane %v4174_v13, 1  ;;  %v2243_v10 = vadd.f32 %v2242_v41, %v2241_v32 }
 0x641   : > { %v2197_v12 = vmax.f32 %v2151_v1, 0.0  ;;  %v2328_v19 = vsel %vm679_vm1, %v2198_v53, 0.0  ;;  %v2269_v53 = vrot.slane %v2268_v50, 2  ;;  %v2235_v16 = vrot.slane %v2234_v5, 1 }
 0x642   : > { %v2323_v43 = vrot.slane %v2322_v21, 2  ;;  %v2280_v1 = vrot.slane %v2279_v57, 1  ;;  %v2261_v17 = vadd.f32 %v2260_v0, %v2259_v37  ;;  %v2308_v55 = vadd.f32 %v2307_v60, %v2306_v59 }
 0x643   : > { %v2327_v54 = vsel %vm679_vm1, %v2197_v12, 0.0  ;;  %v2290_v12 = vadd.f32 %v2289_v51, %v2288_v30  ;;  %v2244_v24 = vrot.slane %v2243_v10, 1  ;;  %v2317_v36 = vadd.f32 %v2316_v11, %v2315_v52  ;;  %v251_v52 = vld [vmem:[%s4254_s2 + $0x70] sm:$0x1] }
 0x644   : > { %v2329_v22 = vadd.f32 %v2328_v19, %v2327_v54  ;;  %v3070_v23 = vpop.f32.mrf.mxu0  ;;  %v2324_v2 = vadd.f32 %v2323_v43, %v2322_v21  ;;  %v2270_v54 = vadd.f32 %v2269_v53, %v2268_v50  ;;  %v2281_v20 = vadd.f32 %v2280_v1, %v2279_v57 }
 0x645   : > { %v2166_v25 = vadd.f32 %v3070_v23, %v4087_v56  ;;  %v2218_v23 = vadd.f32 %v2217_v9, %v4119_v44  ;;  %v2227_v27 = vadd.f32 %v2226_v62, %v4174_v13  ;;  %v2236_v33 = vadd.f32 %v2235_v16, %v2234_v5 }
 0x646   : > { %v2330_v29 = vrot.slane %v2329_v22, 4  ;;  %v2160_v31 = vpop.f32.mrf.mxu0  ;;  %v2325_v14 = vrot.slane %v2324_v2, 1 }
 0x647   : > { %v2200_v34 = vmax.f32 %v2166_v25, 0.0  ;;  %v2161_v35 = vadd.f32 %v4087_v56, %v2160_v31  ;;  %v2251_v56 = vrot.slane %v2250_v38, 2  ;;  %v2380_v25 = vsel %vm2366_vm3, %v2290_v12, %v2281_v20 }
 0x648   : > { %v2331_v58 = vadd.f32 %v2330_v29, %v2329_v22  ;;  %v2209_v22 = vadd.f32 %v2208_v42, %v4107_v28  ;;  %v2326_v26 = vadd.f32 %v2325_v14, %v2324_v2  ;;  %v2262_v29 = vrot.slane %v2261_v17, 1 }
 0x649   : > { %v2199_v48 = vmax.f32 %v2161_v35, 0.0  ;;  %v2337_v47 = vsel %vm679_vm1, %v2200_v34, 0.0  ;;  %v2252_v7 = vadd.f32 %v2251_v56, %v2250_v38  ;;  %v2381_v31 = vsel %vm2368_vm4, %v2299_v18, %v2380_v25 }
 0x64a   : > { %v2332_v49 = vrot.slane %v2331_v58, 2  ;;  %v2271_v34 = vrot.slane %v2270_v54, 1  ;;  %v2382_v35 = vsel %vm2370_vm5, %v2308_v55, %v2381_v31  ;;  %v2245_v42 = vadd.f32 %v2244_v24, %v2243_v10 }
 0x64b   : > { %v2336_v39 = vsel %vm679_vm1, %v2199_v48, 0.0  ;;  %v2253_v61 = vrot.slane %v2252_v7, 1  ;;  %v2383_v44 = vsel %vm2372_vm6, %v2317_v36, %v2382_v35  ;;  %v2367_v38 = vsel %vm2366_vm3, %v2218_v23, %v2209_v22 }
 0x64c   : > { %v2338_v8 = vadd.f32 %v2337_v47, %v2336_v39  ;;  %v2333_v3 = vadd.f32 %v2332_v49, %v2331_v58  ;;  %v2384_v13 = vsel %vm2374_vm7, %v2326_v26, %v2383_v44  ;;  %v2369_v58 = vsel %vm2368_vm4, %v2227_v27, %v2367_v38  ;;  %v2348_v47 = vpop.permute.xlu0 %2347 }
 0x64d   : > { %v2254_v30 = vadd.f32 %v2253_v61, %v2252_v7  ;;  %v2263_v45 = vadd.f32 %v2262_v29, %v2261_v17  ;;  %v2371_v40 = vsel %vm2370_vm5, %v2236_v33, %v2369_v58  ;;  %v2272_v48 = vadd.f32 %v2271_v34, %v2270_v54 }
 0x64e   : > { %v2339_v6 = vrot.slane %v2338_v8, 4  ;;  %v2334_v19 = vrot.slane %v2333_v3, 1  ;;  %v2373_v57 = vsel %vm2372_vm6, %v2245_v42, %v2371_v40 }
 0x64f   : > { %v2375_v59 = vsel %vm2374_vm7, %v2254_v30, %v2373_v57 }
 0x650   : > { %v2340_v15 = vadd.f32 %v2339_v6, %v2338_v8  ;;  %v2335_v32 = vadd.f32 %v2334_v19, %v2333_v3  ;;  %v2377_v49 = vsel %vm2376_vm8, %v2263_v45, %v2375_v59 }
 0x651   : > { %v2379_v41 = vsel %vm2378_vm9, %v2272_v48, %v2377_v49 }
 0x652   : > { %v2341_v21 = vrot.slane %v2340_v15, 2  ;;  %v2385_v37 = vsel %vm2376_vm8, %v2335_v32, %v2384_v13 }
 0x654   : > { %v2342_v4 = vadd.f32 %v2341_v21, %v2340_v15 }
 0x656   : > { %v2343_v28 = vrot.slane %v2342_v4, 1 }
 0x658   : > { %v2344_v43 = vadd.f32 %v2343_v28, %v2342_v4 }
 0x65a   : > { %v2386_v50 = vsel %vm2378_vm9, %v2344_v43, %v2385_v37 }
 0x65b   : > { %3072 = vmatpush3.xpose.msk.msra.mxu0 %vm679_vm1, %v2386_v50 }
 0x65c   : > { %3073 = vmatprep.subr.mxu0 %v4303_v46 }
 0x65f   : > { %3074 = vmatpush3.xpose.msk.msra.mxu0 %vm679_vm1, %v2379_v41 }
 0x662   : > { %3076 = vmatmul.mubr.msk.f32.vlgmr.msra.gmra.mxu0 %vm679_vm1, %v251_v52 }
 0x722   : > { %v2460_v46 = vpop.f32.mrf.mxu0 }
 0x723   : > { %v2461_v39 = vadd.f32 %v2460_v46, %v2348_v47 }
 0x724   : > { %v3077_v56 = vpop.f32.mrf.mxu0 }
 0x725   : > { %2465 = vst.msk [vmem:[%s230_s20] sm:$0x1] %vm2464_vm10, %v2461_v39 }
 0x726   : > { %3171 = shalt.err (!%p3168_p13)
}
 0x727   : > { %s3172_s30 = scalar_lea.hbm %s4216_s12, 16  ;;  %s3176_s6 = scalar_lea.hbm %s4256_s4, 64 }
 0x728   : > { %p3173_p1 = scmp.ne.s32.totalorder %s4216_s12, %s3172_s30  ;;  %p3177_p3 = scmp.lt.s32.totalorder %s4216_s12, %s4256_s4 }
 0x729   : > { %p3178_p6 = scmp.lt.s32.totalorder %s3176_s6, %s3172_s30 }
 0x72a   : > { %p3174_p0 = pnand %p3173_p1, %p4322_p12 }
 0x72b   : > { %p3179_p10 = por %p3178_p6, %p3177_p3 }
 0x72c   : > { %p3175_p2 = pneg %p3174_p0 }
 0x72e   : > { %p3180_p11 = pnand %p3179_p10, %p3175_p2 }
 0x730   : > { %3183 = shalt.err (!%p3180_p11)
}
 0x731   : > { %3080 = dma.vmem_to_hbm [thread:$0]  (%p4322_p12), %s2480_s8, 16, %s4216_s12, %s2467_s23  }
 0x732 PF: > { %p3091_p4 = scmp.ge.s32.totalorder %s3222_s18, 2  ;;  %s2491_s14 = sand.u32 1, %s3210_s15  }
 0x733   : > { %p4323_p5 = scmp.ne.s32.totalorder %s4282_s28, 0  ;;  %s2492_s22 = scalar_lea.sflag [#allocation4], %s2491_s14 }
 0x735   : > { %p3087_p7 = pnand %p3091_p4, %p4323_p5 }
 0x737   : > { %p3088_p8 = pneg %p3087_p7 }
 0x739   : > { %3205 = dma.done.wait (%p3088_p8), %s2492_s22, 16  }
 0x73a   : > { %3207 = vsyncadd (%p3088_p8), %s2492_s22, 4294967280  ;;  %p17_p9 = scmp.ge.s32.totalorder %s3281_s21, 6   ;;  %s4324_s15 = smov %s3214_s16 }
 0x73b   : > { %s4325_s16 = smov %s3218_s17  ;;  %s4326_s17 = smov %s3293_s24 }
 0x73c   : > { %s4327_s18 = smov %s3281_s21  ;;  %19 = sbr.rel (!%p17_p9) target bundleno = 5 (0x5), region = 84 }
 0x741   :  { %2496 = vsyncpa [#allocation3], 1 }
 0x742   :  { %2498 = vsyncpa [#allocation3 + $0x1], 1 }
 0x743   :  { %2499 = vsyncpa [#allocation4], 1 }
 0x744   :  { %2501 = vsyncpa [#allocation4 + $0x1], 1 }

</bundles_post_ra>
